<compile_context>
chip_gen: v7x
topology: tpu7x:2x2x1
jax: 0.10.0
libtpu: 0.0.40
codegen_flags: <defaults>
</compile_context>

<pallas_src>
import functools

import jax
import jax.numpy as jnp
import numpy as np
from jax.experimental import pallas as pl
from jax.experimental.pallas import tpu as pltpu

# ---- hyperparameters (small, consistent with the module) ----
VOCAB = 100
EMB = 32
PAD_IDX = 0
OUT = 4
HID = 32
NUM_LAYERS = 2      # 2 layers x 2 directions = 4 (matches init_hidden's zeros(4, B, H))
BIDIR = True

F32 = jnp.float32
BF16 = jnp.bfloat16

KERNEL_WEIGHT_KEYS = ["tab0", "w0bd", "wih1f", "wih1b", "b1f", "b1b", "whh1f", "wfc", "bfc"]


def _rnn_kernel(ids_ref,    # (B, S)    int32  raw token ids
                tab0_ref,   # (V, 2H)   bf16   emb @ W_ih(l0) + b_ih + b_hh   [fwd | bwd]
                w0bd_ref,   # (2H, 2H)  bf16   blockdiag(W_hh0_fwd, W_hh0_bwd)
                wih1f_ref,  # (2H, H)   bf16   layer-1 W_ih, forward-dest columns (pre-transposed)
                wih1b_ref,  # (2H, H)   bf16   layer-1 W_ih, backward-dest columns
                b1f_ref,    # (1, H)    f32    fused layer-1 forward biases (b_ih + b_hh)
                b1b_ref,    # (1, H)    f32
                whh1f_ref,  # (H, H)    bf16
                wfc_ref,    # (2H, OUT) bf16
                bfc_ref,    # (1, OUT)  f32
                out_ref,    # (B, OUT)  f32
                *, seq, batch):
    H = HID
    ids = ids_ref[...]                                              # (B, S) int32
    tab = tab0_ref[...]                                             # (V, 2H) bf16

    # ---- fused Embedding + layer-0 input projection: exact one-hot gather matmul per timestep.
    #      Biases are already folded into the table rows; everything here is off the serial chain. ----
    iota_v = jax.lax.broadcasted_iota(jnp.int32, (batch, VOCAB), 1)
    add0 = []
    for t in range(seq):
        onehot = jnp.where(ids[:, t:t + 1] == iota_v, 1.0, 0.0).astype(BF16)   # (B, V) exact 0/1
        add0.append(jnp.dot(onehot, tab, preferred_element_type=F32))          # (B, 2H) == table rows

    # ---- layer 0: fwd+bwd fused into one (B, 2H) state with a block-diagonal W_hh.
    #      One matmul + one tanh per step; the zipped addend is a single lane-mask select. ----
    fwd_lane = jax.lax.broadcasted_iota(jnp.int32, (batch, 2 * H), 1) < H
    w0bd = w0bd_ref[...]                                            # hoisted weight load
    h0 = jnp.zeros((batch, 2 * H), F32)
    fused = [None] * seq
    for i in range(seq):                                            # fully unrolled, S static
        addend = jnp.where(fwd_lane, add0[i], add0[seq - 1 - i])    # [fwd@i | bwd@(S-1-i)]
        h0 = jnp.tanh(addend + jnp.dot(h0.astype(BF16), w0bd, preferred_element_type=F32))
        fused[i] = h0                                               # [:, :H]=hf@i, [:, H:]=hb@(S-1-i)

    # ---- layer-1 input projections: de-zip with the same lane mask; per-t small matmuls that are
    #      all independent of the layer-1 recurrence (off the serial chain). ----
    wih1f = wih1f_ref[...]
    b1f = b1f_ref[...]
    p1f = []
    l0_last = None
    for t in range(seq):
        l0_t = jnp.where(fwd_lane, fused[t], fused[seq - 1 - t])    # [fwd@t | bwd@t]  (B, 2H)
        p1f.append(jnp.dot(l0_t.astype(BF16), wih1f, preferred_element_type=F32) + b1f)
        if t == seq - 1:
            l0_last = l0_t

    # Layer-1 backward direction: out[:, -1, :] of the reverse pass is its FIRST step
    # (h_prev = 0, so the W_hh contribution vanishes exactly).
    h1b = jnp.tanh(jnp.dot(l0_last.astype(BF16), wih1b_ref[...], preferred_element_type=F32)
                   + b1b_ref[...])

    # ---- layer-1 forward recurrence (the only remaining serial chain besides layer 0). ----
    whh1f = whh1f_ref[...]
    h1f = jnp.zeros((batch, H), F32)
    for t in range(seq):
        h1f = jnp.tanh(p1f[t] + jnp.dot(h1f.astype(BF16), whh1f, preferred_element_type=F32))

    # ---- fc on out[:, -1, :] = [h1f | h1b]: split W_fc into halves -> no lane concat needed.
    #      (OUT=4 => lane-sparse masked store; acceptable at this size.) ----
    wfc = wfc_ref[...]
    out_ref[...] = (jnp.dot(h1f.astype(BF16), wfc[:H, :], preferred_element_type=F32)
                    + jnp.dot(h1b.astype(BF16), wfc[H:, :], preferred_element_type=F32)
                    + bfc_ref[...])


def rnn_forward(x_tokens, params):
    """x_tokens: int32 (B, S) token ids.  Returns (B, OUT) float32."""
    B, S = x_tokens.shape
    kernel = functools.partial(_rnn_kernel, seq=S, batch=B)
    vmem = pl.BlockSpec(memory_space=pltpu.MemorySpace.VMEM)
    args = [x_tokens] + [params[k] for k in KERNEL_WEIGHT_KEYS]
    return pl.pallas_call(
        kernel,
        out_shape=jax.ShapeDtypeStruct((B, OUT), jnp.float32),
        in_specs=[vmem] * len(args),
        out_specs=vmem,
    )(*args)


def init_params(key):
    """Deterministic synthetic parameters (same shapes as the PyTorch module), packed for the kernel."""
    ks = jax.random.split(key, 24)
    bound = 1.0 / np.sqrt(HID)

    def u(k, shape, b=bound):
        return jax.random.uniform(k, shape, jnp.float32, -b, b)

    emb = jax.random.normal(ks[0], (VOCAB, EMB), jnp.float32)
    emb = emb.at[PAD_IDX].set(0.0)                                  # padding_idx row = 0
    p = {"emb": emb}

    # ---- layer 0 (input size EMB), both directions; pre-transposed weights, fused biases ----
    wih0f, wih0b = u(ks[1], (EMB, HID)), u(ks[2], (EMB, HID))
    whh0f, whh0b = u(ks[3], (HID, HID)), u(ks[4], (HID, HID))
    b0f = u(ks[5], (1, HID)) + u(ks[6], (1, HID))                   # b_ih + b_hh
    b0b = u(ks[7], (1, HID)) + u(ks[8], (1, HID))

    # Fold Embedding + layer-0 input projection + biases into one gather table:
    #   tab0[v] = [ emb[v] @ Wih0_fwd + b_fwd  |  emb[v] @ Wih0_bwd + b_bwd ]
    tab0 = jnp.concatenate([jnp.dot(emb, wih0f) + b0f,
                            jnp.dot(emb, wih0b) + b0b], axis=1)     # (VOCAB, 2H) f32
    p["tab0"] = tab0.astype(BF16)

    p["whh0f"], p["whh0b"] = whh0f.astype(BF16), whh0b.astype(BF16)  # used by the reference
    w0bd = jnp.zeros((2 * HID, 2 * HID), jnp.float32)
    w0bd = w0bd.at[:HID, :HID].set(whh0f).at[HID:, HID:].set(whh0b)
    p["w0bd"] = w0bd.astype(BF16)                                   # blockdiag(whh0f, whh0b)

    # ---- layer 1 (input size 2H), both directions ----
    wih1f, wih1b = u(ks[9], (2 * HID, HID)), u(ks[10], (2 * HID, HID))
    whh1f, whh1b = u(ks[11], (HID, HID)), u(ks[12], (HID, HID))
    b1f = u(ks[13], (1, HID)) + u(ks[14], (1, HID))
    b1b = u(ks[15], (1, HID)) + u(ks[16], (1, HID))
    p["wih1f"], p["wih1b"] = wih1f.astype(BF16), wih1b.astype(BF16)
    p["whh1f"], p["whh1b"] = whh1f.astype(BF16), whh1b.astype(BF16)  # whh1b only used by reference
    p["b1f"], p["b1b"] = b1f, b1b

    fc_bound = 1.0 / np.sqrt(2 * HID)
    p["wfc"] = u(ks[17], (2 * HID, OUT), fc_bound).astype(BF16)
    p["bfc"] = u(ks[18], (1, OUT), fc_bound)
    return p


def rnn_reference(x_tokens, params):
    """Pure-JAX reference with identical semantics and the same bf16-weight / f32-accumulate numerics.
    tab0[v] == emb[v] @ W_ih(layer0) + b_ih + b_hh is an exact algebraic fold of the embedding
    lookup + layer-0 input projection (the layer-0 weights are only ever consumed this way)."""
    H = HID
    B, S = x_tokens.shape
    add0 = jnp.take(params["tab0"], x_tokens, axis=0).astype(F32)   # (B, S, 2H)

    def run_dir(addend, whh, reverse):                              # addend already includes biases
        h = jnp.zeros((B, H), F32)
        outs = [None] * S
        ts = range(S - 1, -1, -1) if reverse else range(S)
        for t in ts:
            h = jnp.tanh(addend[:, t, :]
                         + jnp.dot(h.astype(BF16), whh, preferred_element_type=F32))
            outs[t] = h
        return jnp.stack(outs, axis=1)                              # (B, S, H)

    o0f = run_dir(add0[..., :H], params["whh0f"], False)
    o0b = run_dir(add0[..., H:], params["whh0b"], True)
    l0 = jnp.concatenate([o0f, o0b], axis=-1).astype(BF16)          # (B, S, 2H)

    a1f = jnp.einsum("bsh,hk->bsk", l0, params["wih1f"],
                     preferred_element_type=F32) + params["b1f"]
    a1b = jnp.einsum("bsh,hk->bsk", l0, params["wih1b"],
                     preferred_element_type=F32) + params["b1b"]
    o1f = run_dir(a1f, params["whh1f"], False)
    o1b = run_dir(a1b, params["whh1b"], True)

    last = jnp.concatenate([o1f[:, -1, :], o1b[:, -1, :]], axis=-1).astype(BF16)  # out[:, -1, :]
    return jnp.dot(last, params["wfc"], preferred_element_type=F32) + params["bfc"]


if __name__ == "__main__":
    key = jax.random.PRNGKey(0)
    kx, kp = jax.random.split(key)

    B, S = 2, 8
    x = jax.random.randint(kx, (B, S), 1, VOCAB, dtype=jnp.int32)   # token ids (avoid pad)
    params = init_params(kp)

    out = jax.block_until_ready(rnn_forward(x, params))
    ref = rnn_reference(x, params)

    assert out.shape == (B, OUT), f"bad output shape {out.shape}"
    if not bool(jnp.allclose(out, ref, atol=2e-3, rtol=2e-3)):
        raise AssertionError(f"kernel/reference mismatch:\n{out}\n{ref}")

    print("KERNEL_OK")
</pallas_src>

<mosaic_0001>
module attributes {stable_mosaic.version = 11 : i64} {
  func.func @_rnn_kernel(%arg0: memref<2x8xi32, #tpu.memory_space<vmem>>, %arg1: memref<100x64xbf16, #tpu.memory_space<vmem>>, %arg2: memref<64x64xbf16, #tpu.memory_space<vmem>>, %arg3: memref<64x32xbf16, #tpu.memory_space<vmem>>, %arg4: memref<64x32xbf16, #tpu.memory_space<vmem>>, %arg5: memref<1x32xf32, #tpu.memory_space<vmem>>, %arg6: memref<1x32xf32, #tpu.memory_space<vmem>>, %arg7: memref<32x32xbf16, #tpu.memory_space<vmem>>, %arg8: memref<64x4xbf16, #tpu.memory_space<vmem>>, %arg9: memref<1x4xf32, #tpu.memory_space<vmem>>, %arg10: memref<2x4xf32, #tpu.memory_space<vmem>>) attributes {dimension_semantics = [], scalar_prefetch = 0 : i64, scratch_operands = 0 : i64, tpu.core_type = #tpu.core_type<tc>} {
    %c0 = arith.constant 0 : index
    %c0_0 = arith.constant 0 : index
    %0 = vector.load %arg0[%c0, %c0_0] : memref<2x8xi32, #tpu.memory_space<vmem>>, vector<2x8xi32>
    %c0_1 = arith.constant 0 : index
    %c0_2 = arith.constant 0 : index
    %1 = vector.load %arg1[%c0_1, %c0_2] : memref<100x64xbf16, #tpu.memory_space<vmem>>, vector<100x64xbf16>
    %2 = tpu.iota {dimensions = array<i32: 1>} : vector<2x100xi32>
    %3 = vector.extract_strided_slice %0 {offsets = [0, 0], sizes = [2, 1], strides = [1, 1]} : vector<2x8xi32> to vector<2x1xi32>
    %4 = vector.broadcast %3 : vector<2x1xi32> to vector<2x100xi32>
    %5 = arith.cmpi eq, %4, %2 : vector<2x100xi32>
    %cst = arith.constant 1.000000e+00 : f32
    %cst_3 = arith.constant 0.000000e+00 : f32
    %6 = vector.broadcast %cst : f32 to vector<2x100xf32>
    %7 = vector.broadcast %cst_3 : f32 to vector<2x100xf32>
    %8 = arith.select %5, %6, %7 : vector<2x100xi1>, vector<2x100xf32>
    %9 = arith.truncf %8 : vector<2x100xf32> to vector<2x100xbf16>
    %cst_4 = arith.constant dense<0.000000e+00> : vector<2x64xf32>
    %10 = tpu.matmul %9, %1, %cst_4 {dimension_numbers = #tpu.dot_dimension_numbers<[1], [0], [0], [1], [0, 0, 1, 1], [], []>} : vector<2x100xbf16>, vector<100x64xbf16>, vector<2x64xf32> -> vector<2x64xf32>
    %11 = vector.extract_strided_slice %0 {offsets = [0, 1], sizes = [2, 1], strides = [1, 1]} : vector<2x8xi32> to vector<2x1xi32>
    %12 = vector.broadcast %11 : vector<2x1xi32> to vector<2x100xi32>
    %13 = arith.cmpi eq, %12, %2 : vector<2x100xi32>
    %cst_5 = arith.constant 1.000000e+00 : f32
    %cst_6 = arith.constant 0.000000e+00 : f32
    %14 = vector.broadcast %cst_5 : f32 to vector<2x100xf32>
    %15 = vector.broadcast %cst_6 : f32 to vector<2x100xf32>
    %16 = arith.select %13, %14, %15 : vector<2x100xi1>, vector<2x100xf32>
    %17 = arith.truncf %16 : vector<2x100xf32> to vector<2x100xbf16>
    %cst_7 = arith.constant dense<0.000000e+00> : vector<2x64xf32>
    %18 = tpu.matmul %17, %1, %cst_7 {dimension_numbers = #tpu.dot_dimension_numbers<[1], [0], [0], [1], [0, 0, 1, 1], [], []>} : vector<2x100xbf16>, vector<100x64xbf16>, vector<2x64xf32> -> vector<2x64xf32>
    %19 = vector.extract_strided_slice %0 {offsets = [0, 2], sizes = [2, 1], strides = [1, 1]} : vector<2x8xi32> to vector<2x1xi32>
    %20 = vector.broadcast %19 : vector<2x1xi32> to vector<2x100xi32>
    %21 = arith.cmpi eq, %20, %2 : vector<2x100xi32>
    %cst_8 = arith.constant 1.000000e+00 : f32
    %cst_9 = arith.constant 0.000000e+00 : f32
    %22 = vector.broadcast %cst_8 : f32 to vector<2x100xf32>
    %23 = vector.broadcast %cst_9 : f32 to vector<2x100xf32>
    %24 = arith.select %21, %22, %23 : vector<2x100xi1>, vector<2x100xf32>
    %25 = arith.truncf %24 : vector<2x100xf32> to vector<2x100xbf16>
    %cst_10 = arith.constant dense<0.000000e+00> : vector<2x64xf32>
    %26 = tpu.matmul %25, %1, %cst_10 {dimension_numbers = #tpu.dot_dimension_numbers<[1], [0], [0], [1], [0, 0, 1, 1], [], []>} : vector<2x100xbf16>, vector<100x64xbf16>, vector<2x64xf32> -> vector<2x64xf32>
    %27 = vector.extract_strided_slice %0 {offsets = [0, 3], sizes = [2, 1], strides = [1, 1]} : vector<2x8xi32> to vector<2x1xi32>
    %28 = vector.broadcast %27 : vector<2x1xi32> to vector<2x100xi32>
    %29 = arith.cmpi eq, %28, %2 : vector<2x100xi32>
    %cst_11 = arith.constant 1.000000e+00 : f32
    %cst_12 = arith.constant 0.000000e+00 : f32
    %30 = vector.broadcast %cst_11 : f32 to vector<2x100xf32>
    %31 = vector.broadcast %cst_12 : f32 to vector<2x100xf32>
    %32 = arith.select %29, %30, %31 : vector<2x100xi1>, vector<2x100xf32>
    %33 = arith.truncf %32 : vector<2x100xf32> to vector<2x100xbf16>
    %cst_13 = arith.constant dense<0.000000e+00> : vector<2x64xf32>
    %34 = tpu.matmul %33, %1, %cst_13 {dimension_numbers = #tpu.dot_dimension_numbers<[1], [0], [0], [1], [0, 0, 1, 1], [], []>} : vector<2x100xbf16>, vector<100x64xbf16>, vector<2x64xf32> -> vector<2x64xf32>
    %35 = vector.extract_strided_slice %0 {offsets = [0, 4], sizes = [2, 1], strides = [1, 1]} : vector<2x8xi32> to vector<2x1xi32>
    %36 = vector.broadcast %35 : vector<2x1xi32> to vector<2x100xi32>
    %37 = arith.cmpi eq, %36, %2 : vector<2x100xi32>
    %cst_14 = arith.constant 1.000000e+00 : f32
    %cst_15 = arith.constant 0.000000e+00 : f32
    %38 = vector.broadcast %cst_14 : f32 to vector<2x100xf32>
    %39 = vector.broadcast %cst_15 : f32 to vector<2x100xf32>
    %40 = arith.select %37, %38, %39 : vector<2x100xi1>, vector<2x100xf32>
    %41 = arith.truncf %40 : vector<2x100xf32> to vector<2x100xbf16>
    %cst_16 = arith.constant dense<0.000000e+00> : vector<2x64xf32>
    %42 = tpu.matmul %41, %1, %cst_16 {dimension_numbers = #tpu.dot_dimension_numbers<[1], [0], [0], [1], [0, 0, 1, 1], [], []>} : vector<2x100xbf16>, vector<100x64xbf16>, vector<2x64xf32> -> vector<2x64xf32>
    %43 = vector.extract_strided_slice %0 {offsets = [0, 5], sizes = [2, 1], strides = [1, 1]} : vector<2x8xi32> to vector<2x1xi32>
    %44 = vector.broadcast %43 : vector<2x1xi32> to vector<2x100xi32>
    %45 = arith.cmpi eq, %44, %2 : vector<2x100xi32>
    %cst_17 = arith.constant 1.000000e+00 : f32
    %cst_18 = arith.constant 0.000000e+00 : f32
    %46 = vector.broadcast %cst_17 : f32 to vector<2x100xf32>
    %47 = vector.broadcast %cst_18 : f32 to vector<2x100xf32>
    %48 = arith.select %45, %46, %47 : vector<2x100xi1>, vector<2x100xf32>
    %49 = arith.truncf %48 : vector<2x100xf32> to vector<2x100xbf16>
    %cst_19 = arith.constant dense<0.000000e+00> : vector<2x64xf32>
    %50 = tpu.matmul %49, %1, %cst_19 {dimension_numbers = #tpu.dot_dimension_numbers<[1], [0], [0], [1], [0, 0, 1, 1], [], []>} : vector<2x100xbf16>, vector<100x64xbf16>, vector<2x64xf32> -> vector<2x64xf32>
    %51 = vector.extract_strided_slice %0 {offsets = [0, 6], sizes = [2, 1], strides = [1, 1]} : vector<2x8xi32> to vector<2x1xi32>
    %52 = vector.broadcast %51 : vector<2x1xi32> to vector<2x100xi32>
    %53 = arith.cmpi eq, %52, %2 : vector<2x100xi32>
    %cst_20 = arith.constant 1.000000e+00 : f32
    %cst_21 = arith.constant 0.000000e+00 : f32
    %54 = vector.broadcast %cst_20 : f32 to vector<2x100xf32>
    %55 = vector.broadcast %cst_21 : f32 to vector<2x100xf32>
    %56 = arith.select %53, %54, %55 : vector<2x100xi1>, vector<2x100xf32>
    %57 = arith.truncf %56 : vector<2x100xf32> to vector<2x100xbf16>
    %cst_22 = arith.constant dense<0.000000e+00> : vector<2x64xf32>
    %58 = tpu.matmul %57, %1, %cst_22 {dimension_numbers = #tpu.dot_dimension_numbers<[1], [0], [0], [1], [0, 0, 1, 1], [], []>} : vector<2x100xbf16>, vector<100x64xbf16>, vector<2x64xf32> -> vector<2x64xf32>
    %59 = vector.extract_strided_slice %0 {offsets = [0, 7], sizes = [2, 1], strides = [1, 1]} : vector<2x8xi32> to vector<2x1xi32>
    %60 = vector.broadcast %59 : vector<2x1xi32> to vector<2x100xi32>
    %61 = arith.cmpi eq, %60, %2 : vector<2x100xi32>
    %cst_23 = arith.constant 1.000000e+00 : f32
    %cst_24 = arith.constant 0.000000e+00 : f32
    %62 = vector.broadcast %cst_23 : f32 to vector<2x100xf32>
    %63 = vector.broadcast %cst_24 : f32 to vector<2x100xf32>
    %64 = arith.select %61, %62, %63 : vector<2x100xi1>, vector<2x100xf32>
    %65 = arith.truncf %64 : vector<2x100xf32> to vector<2x100xbf16>
    %cst_25 = arith.constant dense<0.000000e+00> : vector<2x64xf32>
    %66 = tpu.matmul %65, %1, %cst_25 {dimension_numbers = #tpu.dot_dimension_numbers<[1], [0], [0], [1], [0, 0, 1, 1], [], []>} : vector<2x100xbf16>, vector<100x64xbf16>, vector<2x64xf32> -> vector<2x64xf32>
    %67 = tpu.iota {dimensions = array<i32: 1>} : vector<2x64xi32>
    %c32_i32 = arith.constant 32 : i32
    %68 = vector.broadcast %c32_i32 : i32 to vector<2x64xi32>
    %69 = arith.cmpi slt, %67, %68 : vector<2x64xi32>
    %c0_26 = arith.constant 0 : index
    %c0_27 = arith.constant 0 : index
    %70 = vector.load %arg2[%c0_26, %c0_27] : memref<64x64xbf16, #tpu.memory_space<vmem>>, vector<64x64xbf16>
    %cst_28 = arith.constant 0.000000e+00 : f32
    %71 = vector.broadcast %cst_28 : f32 to vector<2x64xf32>
    %72 = arith.select %69, %10, %66 : vector<2x64xi1>, vector<2x64xf32>
    %73 = arith.truncf %71 : vector<2x64xf32> to vector<2x64xbf16>
    %cst_29 = arith.constant dense<0.000000e+00> : vector<2x64xf32>
    %74 = tpu.matmul %73, %70, %cst_29 {dimension_numbers = #tpu.dot_dimension_numbers<[1], [0], [0], [1], [0, 0, 1, 1], [], []>} : vector<2x64xbf16>, vector<64x64xbf16>, vector<2x64xf32> -> vector<2x64xf32>
    %75 = arith.addf %72, %74 : vector<2x64xf32>
    %76 = math.tanh %75 : vector<2x64xf32>
    %77 = arith.select %69, %18, %58 : vector<2x64xi1>, vector<2x64xf32>
    %78 = arith.truncf %76 : vector<2x64xf32> to vector<2x64xbf16>
    %cst_30 = arith.constant dense<0.000000e+00> : vector<2x64xf32>
    %79 = tpu.matmul %78, %70, %cst_30 {dimension_numbers = #tpu.dot_dimension_numbers<[1], [0], [0], [1], [0, 0, 1, 1], [], []>} : vector<2x64xbf16>, vector<64x64xbf16>, vector<2x64xf32> -> vector<2x64xf32>
    %80 = arith.addf %77, %79 : vector<2x64xf32>
    %81 = math.tanh %80 : vector<2x64xf32>
    %82 = arith.select %69, %26, %50 : vector<2x64xi1>, vector<2x64xf32>
    %83 = arith.truncf %81 : vector<2x64xf32> to vector<2x64xbf16>
    %cst_31 = arith.constant dense<0.000000e+00> : vector<2x64xf32>
    %84 = tpu.matmul %83, %70, %cst_31 {dimension_numbers = #tpu.dot_dimension_numbers<[1], [0], [0], [1], [0, 0, 1, 1], [], []>} : vector<2x64xbf16>, vector<64x64xbf16>, vector<2x64xf32> -> vector<2x64xf32>
    %85 = arith.addf %82, %84 : vector<2x64xf32>
    %86 = math.tanh %85 : vector<2x64xf32>
    %87 = arith.select %69, %34, %42 : vector<2x64xi1>, vector<2x64xf32>
    %88 = arith.truncf %86 : vector<2x64xf32> to vector<2x64xbf16>
    %cst_32 = arith.constant dense<0.000000e+00> : vector<2x64xf32>
    %89 = tpu.matmul %88, %70, %cst_32 {dimension_numbers = #tpu.dot_dimension_numbers<[1], [0], [0], [1], [0, 0, 1, 1], [], []>} : vector<2x64xbf16>, vector<64x64xbf16>, vector<2x64xf32> -> vector<2x64xf32>
    %90 = arith.addf %87, %89 : vector<2x64xf32>
    %91 = math.tanh %90 : vector<2x64xf32>
    %92 = arith.select %69, %42, %34 : vector<2x64xi1>, vector<2x64xf32>
    %93 = arith.truncf %91 : vector<2x64xf32> to vector<2x64xbf16>
    %cst_33 = arith.constant dense<0.000000e+00> : vector<2x64xf32>
    %94 = tpu.matmul %93, %70, %cst_33 {dimension_numbers = #tpu.dot_dimension_numbers<[1], [0], [0], [1], [0, 0, 1, 1], [], []>} : vector<2x64xbf16>, vector<64x64xbf16>, vector<2x64xf32> -> vector<2x64xf32>
    %95 = arith.addf %92, %94 : vector<2x64xf32>
    %96 = math.tanh %95 : vector<2x64xf32>
    %97 = arith.select %69, %50, %26 : vector<2x64xi1>, vector<2x64xf32>
    %98 = arith.truncf %96 : vector<2x64xf32> to vector<2x64xbf16>
    %cst_34 = arith.constant dense<0.000000e+00> : vector<2x64xf32>
    %99 = tpu.matmul %98, %70, %cst_34 {dimension_numbers = #tpu.dot_dimension_numbers<[1], [0], [0], [1], [0, 0, 1, 1], [], []>} : vector<2x64xbf16>, vector<64x64xbf16>, vector<2x64xf32> -> vector<2x64xf32>
    %100 = arith.addf %97, %99 : vector<2x64xf32>
    %101 = math.tanh %100 : vector<2x64xf32>
    %102 = arith.select %69, %58, %18 : vector<2x64xi1>, vector<2x64xf32>
    %103 = arith.truncf %101 : vector<2x64xf32> to vector<2x64xbf16>
    %cst_35 = arith.constant dense<0.000000e+00> : vector<2x64xf32>
    %104 = tpu.matmul %103, %70, %cst_35 {dimension_numbers = #tpu.dot_dimension_numbers<[1], [0], [0], [1], [0, 0, 1, 1], [], []>} : vector<2x64xbf16>, vector<64x64xbf16>, vector<2x64xf32> -> vector<2x64xf32>
    %105 = arith.addf %102, %104 : vector<2x64xf32>
    %106 = math.tanh %105 : vector<2x64xf32>
    %107 = arith.select %69, %66, %10 : vector<2x64xi1>, vector<2x64xf32>
    %108 = arith.truncf %106 : vector<2x64xf32> to vector<2x64xbf16>
    %cst_36 = arith.constant dense<0.000000e+00> : vector<2x64xf32>
    %109 = tpu.matmul %108, %70, %cst_36 {dimension_numbers = #tpu.dot_dimension_numbers<[1], [0], [0], [1], [0, 0, 1, 1], [], []>} : vector<2x64xbf16>, vector<64x64xbf16>, vector<2x64xf32> -> vector<2x64xf32>
    %110 = arith.addf %107, %109 : vector<2x64xf32>
    %111 = math.tanh %110 : vector<2x64xf32>
    %c0_37 = arith.constant 0 : index
    %c0_38 = arith.constant 0 : index
    %112 = vector.load %arg3[%c0_37, %c0_38] : memref<64x32xbf16, #tpu.memory_space<vmem>>, vector<64x32xbf16>
    %c0_39 = arith.constant 0 : index
    %c0_40 = arith.constant 0 : index
    %113 = vector.load %arg5[%c0_39, %c0_40] : memref<1x32xf32, #tpu.memory_space<vmem>>, vector<1x32xf32>
    %114 = arith.select %69, %76, %111 : vector<2x64xi1>, vector<2x64xf32>
    %115 = arith.truncf %114 : vector<2x64xf32> to vector<2x64xbf16>
    %cst_41 = arith.constant dense<0.000000e+00> : vector<2x32xf32>
    %116 = tpu.matmul %115, %112, %cst_41 {dimension_numbers = #tpu.dot_dimension_numbers<[1], [0], [0], [1], [0, 0, 1, 1], [], []>} : vector<2x64xbf16>, vector<64x32xbf16>, vector<2x32xf32> -> vector<2x32xf32>
    %117 = vector.broadcast %113 : vector<1x32xf32> to vector<2x32xf32>
    %118 = arith.addf %116, %117 : vector<2x32xf32>
    %119 = arith.select %69, %81, %106 : vector<2x64xi1>, vector<2x64xf32>
    %120 = arith.truncf %119 : vector<2x64xf32> to vector<2x64xbf16>
    %cst_42 = arith.constant dense<0.000000e+00> : vector<2x32xf32>
    %121 = tpu.matmul %120, %112, %cst_42 {dimension_numbers = #tpu.dot_dimension_numbers<[1], [0], [0], [1], [0, 0, 1, 1], [], []>} : vector<2x64xbf16>, vector<64x32xbf16>, vector<2x32xf32> -> vector<2x32xf32>
    %122 = vector.broadcast %113 : vector<1x32xf32> to vector<2x32xf32>
    %123 = arith.addf %121, %122 : vector<2x32xf32>
    %124 = arith.select %69, %86, %101 : vector<2x64xi1>, vector<2x64xf32>
    %125 = arith.truncf %124 : vector<2x64xf32> to vector<2x64xbf16>
    %cst_43 = arith.constant dense<0.000000e+00> : vector<2x32xf32>
    %126 = tpu.matmul %125, %112, %cst_43 {dimension_numbers = #tpu.dot_dimension_numbers<[1], [0], [0], [1], [0, 0, 1, 1], [], []>} : vector<2x64xbf16>, vector<64x32xbf16>, vector<2x32xf32> -> vector<2x32xf32>
    %127 = vector.broadcast %113 : vector<1x32xf32> to vector<2x32xf32>
    %128 = arith.addf %126, %127 : vector<2x32xf32>
    %129 = arith.select %69, %91, %96 : vector<2x64xi1>, vector<2x64xf32>
    %130 = arith.truncf %129 : vector<2x64xf32> to vector<2x64xbf16>
    %cst_44 = arith.constant dense<0.000000e+00> : vector<2x32xf32>
    %131 = tpu.matmul %130, %112, %cst_44 {dimension_numbers = #tpu.dot_dimension_numbers<[1], [0], [0], [1], [0, 0, 1, 1], [], []>} : vector<2x64xbf16>, vector<64x32xbf16>, vector<2x32xf32> -> vector<2x32xf32>
    %132 = vector.broadcast %113 : vector<1x32xf32> to vector<2x32xf32>
    %133 = arith.addf %131, %132 : vector<2x32xf32>
    %134 = arith.select %69, %96, %91 : vector<2x64xi1>, vector<2x64xf32>
    %135 = arith.truncf %134 : vector<2x64xf32> to vector<2x64xbf16>
    %cst_45 = arith.constant dense<0.000000e+00> : vector<2x32xf32>
    %136 = tpu.matmul %135, %112, %cst_45 {dimension_numbers = #tpu.dot_dimension_numbers<[1], [0], [0], [1], [0, 0, 1, 1], [], []>} : vector<2x64xbf16>, vector<64x32xbf16>, vector<2x32xf32> -> vector<2x32xf32>
    %137 = vector.broadcast %113 : vector<1x32xf32> to vector<2x32xf32>
    %138 = arith.addf %136, %137 : vector<2x32xf32>
    %139 = arith.select %69, %101, %86 : vector<2x64xi1>, vector<2x64xf32>
    %140 = arith.truncf %139 : vector<2x64xf32> to vector<2x64xbf16>
    %cst_46 = arith.constant dense<0.000000e+00> : vector<2x32xf32>
    %141 = tpu.matmul %140, %112, %cst_46 {dimension_numbers = #tpu.dot_dimension_numbers<[1], [0], [0], [1], [0, 0, 1, 1], [], []>} : vector<2x64xbf16>, vector<64x32xbf16>, vector<2x32xf32> -> vector<2x32xf32>
    %142 = vector.broadcast %113 : vector<1x32xf32> to vector<2x32xf32>
    %143 = arith.addf %141, %142 : vector<2x32xf32>
    %144 = arith.select %69, %106, %81 : vector<2x64xi1>, vector<2x64xf32>
    %145 = arith.truncf %144 : vector<2x64xf32> to vector<2x64xbf16>
    %cst_47 = arith.constant dense<0.000000e+00> : vector<2x32xf32>
    %146 = tpu.matmul %145, %112, %cst_47 {dimension_numbers = #tpu.dot_dimension_numbers<[1], [0], [0], [1], [0, 0, 1, 1], [], []>} : vector<2x64xbf16>, vector<64x32xbf16>, vector<2x32xf32> -> vector<2x32xf32>
    %147 = vector.broadcast %113 : vector<1x32xf32> to vector<2x32xf32>
    %148 = arith.addf %146, %147 : vector<2x32xf32>
    %149 = arith.select %69, %111, %76 : vector<2x64xi1>, vector<2x64xf32>
    %150 = arith.truncf %149 : vector<2x64xf32> to vector<2x64xbf16>
    %cst_48 = arith.constant dense<0.000000e+00> : vector<2x32xf32>
    %151 = tpu.matmul %150, %112, %cst_48 {dimension_numbers = #tpu.dot_dimension_numbers<[1], [0], [0], [1], [0, 0, 1, 1], [], []>} : vector<2x64xbf16>, vector<64x32xbf16>, vector<2x32xf32> -> vector<2x32xf32>
    %152 = vector.broadcast %113 : vector<1x32xf32> to vector<2x32xf32>
    %153 = arith.addf %151, %152 : vector<2x32xf32>
    %154 = arith.truncf %149 : vector<2x64xf32> to vector<2x64xbf16>
    %c0_49 = arith.constant 0 : index
    %c0_50 = arith.constant 0 : index
    %155 = vector.load %arg4[%c0_49, %c0_50] : memref<64x32xbf16, #tpu.memory_space<vmem>>, vector<64x32xbf16>
    %cst_51 = arith.constant dense<0.000000e+00> : vector<2x32xf32>
    %156 = tpu.matmul %154, %155, %cst_51 {dimension_numbers = #tpu.dot_dimension_numbers<[1], [0], [0], [1], [0, 0, 1, 1], [], []>} : vector<2x64xbf16>, vector<64x32xbf16>, vector<2x32xf32> -> vector<2x32xf32>
    %c0_52 = arith.constant 0 : index
    %c0_53 = arith.constant 0 : index
    %157 = vector.load %arg6[%c0_52, %c0_53] : memref<1x32xf32, #tpu.memory_space<vmem>>, vector<1x32xf32>
    %158 = vector.broadcast %157 : vector<1x32xf32> to vector<2x32xf32>
    %159 = arith.addf %156, %158 : vector<2x32xf32>
    %160 = math.tanh %159 : vector<2x32xf32>
    %c0_54 = arith.constant 0 : index
    %c0_55 = arith.constant 0 : index
    %161 = vector.load %arg7[%c0_54, %c0_55] : memref<32x32xbf16, #tpu.memory_space<vmem>>, vector<32x32xbf16>
    %cst_56 = arith.constant 0.000000e+00 : f32
    %162 = vector.broadcast %cst_56 : f32 to vector<2x32xf32>
    %163 = arith.truncf %162 : vector<2x32xf32> to vector<2x32xbf16>
    %cst_57 = arith.constant dense<0.000000e+00> : vector<2x32xf32>
    %164 = tpu.matmul %163, %161, %cst_57 {dimension_numbers = #tpu.dot_dimension_numbers<[1], [0], [0], [1], [0, 0, 1, 1], [], []>} : vector<2x32xbf16>, vector<32x32xbf16>, vector<2x32xf32> -> vector<2x32xf32>
    %165 = arith.addf %118, %164 : vector<2x32xf32>
    %166 = math.tanh %165 : vector<2x32xf32>
    %167 = arith.truncf %166 : vector<2x32xf32> to vector<2x32xbf16>
    %cst_58 = arith.constant dense<0.000000e+00> : vector<2x32xf32>
    %168 = tpu.matmul %167, %161, %cst_58 {dimension_numbers = #tpu.dot_dimension_numbers<[1], [0], [0], [1], [0, 0, 1, 1], [], []>} : vector<2x32xbf16>, vector<32x32xbf16>, vector<2x32xf32> -> vector<2x32xf32>
    %169 = arith.addf %123, %168 : vector<2x32xf32>
    %170 = math.tanh %169 : vector<2x32xf32>
    %171 = arith.truncf %170 : vector<2x32xf32> to vector<2x32xbf16>
    %cst_59 = arith.constant dense<0.000000e+00> : vector<2x32xf32>
    %172 = tpu.matmul %171, %161, %cst_59 {dimension_numbers = #tpu.dot_dimension_numbers<[1], [0], [0], [1], [0, 0, 1, 1], [], []>} : vector<2x32xbf16>, vector<32x32xbf16>, vector<2x32xf32> -> vector<2x32xf32>
    %173 = arith.addf %128, %172 : vector<2x32xf32>
    %174 = math.tanh %173 : vector<2x32xf32>
    %175 = arith.truncf %174 : vector<2x32xf32> to vector<2x32xbf16>
    %cst_60 = arith.constant dense<0.000000e+00> : vector<2x32xf32>
    %176 = tpu.matmul %175, %161, %cst_60 {dimension_numbers = #tpu.dot_dimension_numbers<[1], [0], [0], [1], [0, 0, 1, 1], [], []>} : vector<2x32xbf16>, vector<32x32xbf16>, vector<2x32xf32> -> vector<2x32xf32>
    %177 = arith.addf %133, %176 : vector<2x32xf32>
    %178 = math.tanh %177 : vector<2x32xf32>
    %179 = arith.truncf %178 : vector<2x32xf32> to vector<2x32xbf16>
    %cst_61 = arith.constant dense<0.000000e+00> : vector<2x32xf32>
    %180 = tpu.matmul %179, %161, %cst_61 {dimension_numbers = #tpu.dot_dimension_numbers<[1], [0], [0], [1], [0, 0, 1, 1], [], []>} : vector<2x32xbf16>, vector<32x32xbf16>, vector<2x32xf32> -> vector<2x32xf32>
    %181 = arith.addf %138, %180 : vector<2x32xf32>
    %182 = math.tanh %181 : vector<2x32xf32>
    %183 = arith.truncf %182 : vector<2x32xf32> to vector<2x32xbf16>
    %cst_62 = arith.constant dense<0.000000e+00> : vector<2x32xf32>
    %184 = tpu.matmul %183, %161, %cst_62 {dimension_numbers = #tpu.dot_dimension_numbers<[1], [0], [0], [1], [0, 0, 1, 1], [], []>} : vector<2x32xbf16>, vector<32x32xbf16>, vector<2x32xf32> -> vector<2x32xf32>
    %185 = arith.addf %143, %184 : vector<2x32xf32>
    %186 = math.tanh %185 : vector<2x32xf32>
    %187 = arith.truncf %186 : vector<2x32xf32> to vector<2x32xbf16>
    %cst_63 = arith.constant dense<0.000000e+00> : vector<2x32xf32>
    %188 = tpu.matmul %187, %161, %cst_63 {dimension_numbers = #tpu.dot_dimension_numbers<[1], [0], [0], [1], [0, 0, 1, 1], [], []>} : vector<2x32xbf16>, vector<32x32xbf16>, vector<2x32xf32> -> vector<2x32xf32>
    %189 = arith.addf %148, %188 : vector<2x32xf32>
    %190 = math.tanh %189 : vector<2x32xf32>
    %191 = arith.truncf %190 : vector<2x32xf32> to vector<2x32xbf16>
    %cst_64 = arith.constant dense<0.000000e+00> : vector<2x32xf32>
    %192 = tpu.matmul %191, %161, %cst_64 {dimension_numbers = #tpu.dot_dimension_numbers<[1], [0], [0], [1], [0, 0, 1, 1], [], []>} : vector<2x32xbf16>, vector<32x32xbf16>, vector<2x32xf32> -> vector<2x32xf32>
    %193 = arith.addf %153, %192 : vector<2x32xf32>
    %194 = math.tanh %193 : vector<2x32xf32>
    %c0_65 = arith.constant 0 : index
    %c0_66 = arith.constant 0 : index
    %195 = vector.load %arg8[%c0_65, %c0_66] : memref<64x4xbf16, #tpu.memory_space<vmem>>, vector<64x4xbf16>
    %196 = arith.truncf %194 : vector<2x32xf32> to vector<2x32xbf16>
    %197 = vector.extract_strided_slice %195 {offsets = [0, 0], sizes = [32, 4], strides = [1, 1]} : vector<64x4xbf16> to vector<32x4xbf16>
    %cst_67 = arith.constant dense<0.000000e+00> : vector<2x4xf32>
    %198 = tpu.matmul %196, %197, %cst_67 {dimension_numbers = #tpu.dot_dimension_numbers<[1], [0], [0], [1], [0, 0, 1, 1], [], []>} : vector<2x32xbf16>, vector<32x4xbf16>, vector<2x4xf32> -> vector<2x4xf32>
    %199 = arith.truncf %160 : vector<2x32xf32> to vector<2x32xbf16>
    %200 = vector.extract_strided_slice %195 {offsets = [32, 0], sizes = [32, 4], strides = [1, 1]} : vector<64x4xbf16> to vector<32x4xbf16>
    %cst_68 = arith.constant dense<0.000000e+00> : vector<2x4xf32>
    %201 = tpu.matmul %199, %200, %cst_68 {dimension_numbers = #tpu.dot_dimension_numbers<[1], [0], [0], [1], [0, 0, 1, 1], [], []>} : vector<2x32xbf16>, vector<32x4xbf16>, vector<2x4xf32> -> vector<2x4xf32>
    %202 = arith.addf %198, %201 : vector<2x4xf32>
    %c0_69 = arith.constant 0 : index
    %c0_70 = arith.constant 0 : index
    %203 = vector.load %arg9[%c0_69, %c0_70] : memref<1x4xf32, #tpu.memory_space<vmem>>, vector<1x4xf32>
    %204 = vector.broadcast %203 : vector<1x4xf32> to vector<2x4xf32>
    %205 = arith.addf %202, %204 : vector<2x4xf32>
    %c0_71 = arith.constant 0 : index
    %c0_72 = arith.constant 0 : index
    %206 = vector.load %arg10[%c0_71, %c0_72] : memref<2x4xf32, #tpu.memory_space<vmem>>, vector<2x4xf32>
    tpu.vector_store %arg10[%c0_71, %c0_72], %205 {strides = array<i32>} : memref<2x4xf32, #tpu.memory_space<vmem>>, vector<2x4xf32>,
    return
  }
}

</mosaic_0001>

<bundles_post_ra>
// kernel: tpu_custom_call.1
= control target key start
LH: loop header
LB: loop body
LE: loop exit
PB: predicated region body
PF: predicated region fallthrough
CT: control target
= control target key end

     0   :  { %v2715_v1 = vmov 0   ;;  %v2716_v2 = vmov 2   ;;  %v2717_v4 = vmov 0.0   ;;  %v2718_v6 = vmov 1   ;;  %s3421_s0 = inlined_call_operand.vmem [shape: s32[2,8], index: 0, kind: input, shape index: {}]   ;;  %s3422_s1 = inlined_call_operand.vmem [shape: bf16[100,64], index: 1, kind: input, shape index: {}]   ;;  %s3423_s2 = inlined_call_operand.vmem [shape: bf16[64,64], index: 2, kind: input, shape index: {}]   ;;  %s3424_s3 = inlined_call_operand.vmem [shape: bf16[64,32], index: 3, kind: input, shape index: {}]   ;;  %s3425_s4 = inlined_call_operand.vmem [shape: bf16[64,32], index: 4, kind: input, shape index: {}]   ;;  %s3426_s5 = inlined_call_operand.vmem [shape: f32[1,32], index: 5, kind: input, shape index: {}]   ;;  %s3427_s6 = inlined_call_operand.vmem [shape: f32[1,32], index: 6, kind: input, shape index: {}]   ;;  %s3428_s7 = inlined_call_operand.vmem [shape: bf16[32,32], index: 7, kind: input, shape index: {}]   ;;  %s3429_s8 = inlined_call_operand.vmem [shape: bf16[64,4], index: 8, kind: input, shape index: {}]   ;;  %s3430_s9 = inlined_call_operand.vmem [shape: f32[1,4], index: 9, kind: input, shape index: {}]   ;;  %s3431_s10 = inlined_call_operand.hbm [shape: f32[2,4], index: 10, kind: output, shape index: {}]  }
   0x1   :  { %v37_v0 = vld [vmem:[%s3421_s0] sm:$0x3]  ;;  %2623 = vset.pattern.permute.xlu0 %v2715_v1  ;;  %2625 = vset.pattern.permute.xlu1 %v2716_v2  ;;  %v2796_v5 = vld [vmem:[%s3422_s1 + $0x8] sm:$0xff]   ;;  %v2719_v7 = vmov 3   ;;  %v2805_v8 = vld [vmem:[%s3422_s1 + $0x10] sm:$0xff]   ;;  %vm2720_vm0 = vmmov 0  }
   0x2   :  { %54 = vperm.xlu0 %2623, %v37_v0   ;;  %196 = vperm.xlu1 %2625, %v37_v0   ;;  %v2788_v3 = vld [vmem:[%s3422_s1] sm:$0xff]   ;;  %v2721_v9 = vmov 4   ;;  %v2722_v10 = vmov 5   ;;  %v2817_v11 = vld [vmem:[%s3422_s1 + $0x18] sm:$0xff]   ;;  %v2723_v13 = vmov 6   ;;  %v2724_v14 = vmov 7  }
   0x3   :  { %2144 = vmatprep.subr.bf16.mxu0 %v2717_v4  ;;  %2162 = vmatprep.subr.bf16.mxu1 %v2717_v4  ;;  %v2826_v12 = vld [vmem:[%s3422_s1 + $0x20] sm:$0xff]   ;;  %v2836_v15 = vld [vmem:[%s3422_s1 + $0x28] sm:$0xff]  }
   0x4   :  { %2145 = vmatpush3.bf16.msra.mxu0 %v2788_v3  ;;  %2163 = vmatpush3.bf16.msra.mxu1 %v2788_v3 }
   0x5   :  { %2146 = vmatprep.subr.bf16.mxu0 %v2717_v4  ;;  %2164 = vmatprep.subr.bf16.mxu1 %v2717_v4 }
   0x6   :  { %2624 = vset.pattern.permute.xlu0 %v2718_v6  ;;  %2626 = vset.pattern.permute.xlu1 %v2719_v7 }
   0x7   :  { %147 = vperm.xlu0 %2624, %v37_v0   ;;  %245 = vperm.xlu1 %2626, %v37_v0  }
   0x8   :  { %2147 = vmatpush3.bf16.msra.mxu0 %v2796_v5  ;;  %2165 = vmatpush3.bf16.msra.mxu1 %v2796_v5 }
   0x9   :  { %2148 = vmatprep.subr.bf16.mxu0 %v2717_v4  ;;  %2166 = vmatprep.subr.bf16.mxu1 %v2717_v4 }
   0xa   :  { %2158 = vmatprep.mubr.msk.bf16.mxu0 %vm2720_vm0, %v2717_v4  ;;  %2176 = vmatprep.mubr.msk.bf16.mxu1 %vm2720_vm0, %v2717_v4 }
   0xb   :  { %2627 = vset.pattern.permute.xlu1 %v2721_v9  ;;  %2628 = vset.pattern.permute.xlu0 %v2722_v10 }
   0xc   :  { %294 = vperm.xlu1 %2627, %v37_v0   ;;  %343 = vperm.xlu0 %2628, %v37_v0  }
   0xd   :  { %2149 = vmatpush3.bf16.msra.mxu0 %v2805_v8  ;;  %2167 = vmatpush3.bf16.msra.mxu1 %v2805_v8 }
   0xe   :  { %2150 = vmatprep.subr.bf16.mxu0 %v2717_v4  ;;  %2168 = vmatprep.subr.bf16.mxu1 %v2717_v4 }
  0x10   :  { %2629 = vset.pattern.permute.xlu1 %v2723_v13  ;;  %2631 = vset.pattern.permute.xlu0 %v2724_v14 }
  0x11   :  { %392 = vperm.xlu1 %2629, %v37_v0   ;;  %2151 = vmatpush3.bf16.msra.mxu0 %v2817_v11 }
  0x12   :  { %2152 = vmatprep.subr.bf16.mxu0 %v2717_v4  ;;  %2169 = vmatpush3.bf16.msra.mxu1 %v2817_v11 }
  0x13   :  { %2170 = vmatprep.subr.bf16.mxu1 %v2717_v4 }
  0x15   :  { %2630 = vset.pattern.permute.xlu1 %v2724_v14  ;;  %2153 = vmatpush3.bf16.msra.mxu0 %v2826_v12 }
  0x16   :  { %15 = vsyncpa [#allocation3], 0  ;;  %441 = vperm.xlu1 %2630, %v37_v0   ;;  %2154 = vmatprep.subr.bf16.mxu0 %v2717_v4  ;;  %v2638_v16 = vld [vmem:[%s3422_s1 + $0x30] ss:$0 sps:$4 sm:$0x33]   ;;  %vm102_vm1 = vcmask 1041408   ;;  %v51_v18 = vlaneseq }
  0x17   :  { %2171 = vmatpush3.bf16.msra.mxu1 %v2826_v12  ;;  %v2846_v17 = vsel %vm102_vm1, %v2638_v16, 0  ;;  %vm98_vm3 = vcmask 818176   ;;  %v2971_v42 = vld [vmem:[%s3423_s2] sm:$0xff]   ;;  %v2982_v45 = vld [vmem:[%s3423_s2 + $0x8] sm:$0xff]   ;;  %v2994_v46 = vld [vmem:[%s3423_s2 + $0x10] sm:$0xff]   ;;  %vm523_vm12 = vcmask 523264  }
  0x18   :  { %2172 = vmatprep.subr.bf16.mxu1 %v2717_v4  ;;  %v2854_v19 = vand.u32 127, %v51_v18  ;;  %v3005_v47 = vld [vmem:[%s3423_s2 + $0x18] sm:$0xff]   ;;  %vm1393_vm13 = vcmask 261120   ;;  %vm1888_vm14 = vcmask 25600  }
  0x19   :  { %2155 = vmatpush3.bf16.msra.mxu0 %v2836_v15 }
  0x1a   :  { %2156 = vmatprep.subr.bf16.mxu0 %v2717_v4  ;;  %vm489_vm11 = vcmp.lt.s32.totalorder %v2854_v19, 32 }
  0x1b   :  { %2173 = vmatpush3.bf16.msra.mxu1 %v2836_v15 }
  0x1c   :  { %2174 = vmatprep.subr.bf16.mxu1 %v2717_v4 }
  0x1d   :  { %2157 = vmatpush3.bf16.msra.mxu0 %v2846_v17 }
  0x1e   :  { %2180 = vmatprep.subr.bf16.mxu0 %v2717_v4 }
  0x1f   :  { %2175 = vmatpush3.bf16.msra.mxu1 %v2846_v17 }
  0x20   :  { %2198 = vmatprep.subr.bf16.mxu1 %v2717_v4 }
  0x81   :  { %v55_v20 = vpop.permute.xlu0 %54  ;;  %v197_v26 = vpop.permute.xlu1 %196 }
  0x82   :  { %vm56_vm2 = vcmp.eq.s32.totalorder %v55_v20, %v2854_v19  ;;  %vm198_vm5 = vcmp.eq.s32.totalorder %v197_v26, %v2854_v19 }
  0x83   :  { %v57_v21 = vsel %vm56_vm2, 1.0, %v2717_v4  ;;  %v199_v28 = vsel %vm198_vm5, 1.0, %v2717_v4 }
  0x84   :  { %v58_v22 = vpack.c.bf16 %v57_v21, %v57_v21  ;;  %v200_v29 = vpack.c.bf16 %v199_v28, %v199_v28 }
  0x86   :  { %2159 = vmatmul.mubr.msk.bf16.vlgmr.msra.gmra.mrb[0].mxu0 %vm98_vm3, %v58_v22  ;;  %v148_v23 = vpop.permute.xlu0 %147  ;;  %v246_v27 = vpop.permute.xlu1 %245 }
  0x87   :  { %2181 = vmatpush3.bf16.msra.mxu0 %v2788_v3  ;;  %vm149_vm4 = vcmp.eq.s32.totalorder %v148_v23, %v2854_v19  ;;  %2194 = vmatprep.mubr.msk.bf16.mxu0 %vm2720_vm0, %v2717_v4  ;;  %vm247_vm6 = vcmp.eq.s32.totalorder %v246_v27, %v2854_v19 }
  0x88   :  { %v150_v24 = vsel %vm149_vm4, 1.0, %v2717_v4  ;;  %2182 = vmatprep.subr.bf16.mxu0 %v2717_v4  ;;  %v248_v30 = vsel %vm247_vm6, 1.0, %v2717_v4 }
  0x89   :  { %v151_v25 = vpack.c.bf16 %v150_v24, %v150_v24  ;;  %v249_v31 = vpack.c.bf16 %v248_v30, %v248_v30 }
  0x8b   :  { %2183 = vmatpush3.bf16.msra.mxu0 %v2796_v5  ;;  %2177 = vmatmul.mubr.msk.bf16.vlgmr.msra.gmra.mrb[0].mxu1 %vm98_vm3, %v151_v25  ;;  %v295_v32 = vpop.permute.xlu1 %294  ;;  %v344_v33 = vpop.permute.xlu0 %343 }
  0x8c   :  { %2199 = vmatpush3.bf16.msra.mxu1 %v2788_v3  ;;  %2184 = vmatprep.subr.bf16.mxu0 %v2717_v4  ;;  %vm296_vm7 = vcmp.eq.s32.totalorder %v295_v32, %v2854_v19  ;;  %vm345_vm8 = vcmp.eq.s32.totalorder %v344_v33, %v2854_v19 }
  0x8d   :  { %2200 = vmatprep.subr.bf16.mxu1 %v2717_v4  ;;  %2212 = vmatprep.mubr.msk.bf16.mxu1 %vm2720_vm0, %v2717_v4  ;;  %v297_v34 = vsel %vm296_vm7, 1.0, %v2717_v4  ;;  %v346_v36 = vsel %vm345_vm8, 1.0, %v2717_v4 }
  0x8e   :  { %v298_v35 = vpack.c.bf16 %v297_v34, %v297_v34  ;;  %v347_v37 = vpack.c.bf16 %v346_v36, %v346_v36 }
  0x8f   :  { %2185 = vmatpush3.bf16.msra.mxu0 %v2805_v8 }
  0x90   :  { %2201 = vmatpush3.bf16.msra.mxu1 %v2796_v5  ;;  %2186 = vmatprep.subr.bf16.mxu0 %v2717_v4  ;;  %v393_v38 = vpop.permute.xlu1 %392 }
  0x91   :  { %2202 = vmatprep.subr.bf16.mxu1 %v2717_v4  ;;  %vm394_vm9 = vcmp.eq.s32.totalorder %v393_v38, %v2854_v19 }
  0x92   :  { %v395_v40 = vsel %vm394_vm9, 1.0, %v2717_v4 }
  0x93   :  { %2187 = vmatpush3.bf16.msra.mxu0 %v2817_v11  ;;  %v396_v41 = vpack.c.bf16 %v395_v40, %v395_v40 }
  0x94   :  { %2203 = vmatpush3.bf16.msra.mxu1 %v2805_v8  ;;  %2188 = vmatprep.subr.bf16.mxu0 %v2717_v4 }
  0x95   :  { %2204 = vmatprep.subr.bf16.mxu1 %v2717_v4  ;;  %v442_v39 = vpop.permute.xlu1 %441 }
  0x96   :  { %vm443_vm10 = vcmp.eq.s32.totalorder %v442_v39, %v2854_v19  ;;  %v2649_v19 = vld [vmem:[%s3425_s4 + $0x10] sm:$0xff]  }
  0x97   :  { %2189 = vmatpush3.bf16.msra.mxu0 %v2826_v12  ;;  %v444_v43 = vsel %vm443_vm10, 1.0, %v2717_v4 }
  0x98   :  { %2205 = vmatpush3.bf16.msra.mxu1 %v2817_v11  ;;  %2190 = vmatprep.subr.bf16.mxu0 %v2717_v4  ;;  %v445_v44 = vpack.c.bf16 %v444_v43, %v444_v43 }
  0x99   :  { %2206 = vmatprep.subr.bf16.mxu1 %v2717_v4 }
  0x9b   :  { %2191 = vmatpush3.bf16.msra.mxu0 %v2836_v15 }
  0x9c   :  { %2207 = vmatpush3.bf16.msra.mxu1 %v2826_v12  ;;  %2192 = vmatprep.subr.bf16.mxu0 %v2717_v4 }
  0x9d   :  { %2208 = vmatprep.subr.bf16.mxu1 %v2717_v4 }
  0x9f   :  { %2193 = vmatpush3.bf16.msra.mxu0 %v2846_v17 }
  0xa0   :  { %2209 = vmatpush3.bf16.msra.mxu1 %v2836_v15  ;;  %2216 = vmatprep.subr.bf16.mxu0 %v2717_v4 }
  0xa1   :  { %2210 = vmatprep.subr.bf16.mxu1 %v2717_v4 }
  0xa2   :  { %2195 = vmatmul.mubr.msk.bf16.vlgmr.msra.gmra.mrb[4].mxu0 %vm98_vm3, %v200_v29 }
  0xa3   :  { %2217 = vmatpush3.bf16.msra.mxu0 %v2788_v3  ;;  %2230 = vmatprep.mubr.msk.bf16.mxu0 %vm2720_vm0, %v2717_v4 }
  0xa4   :  { %2211 = vmatpush3.bf16.msra.mxu1 %v2846_v17  ;;  %2218 = vmatprep.subr.bf16.mxu0 %v2717_v4 }
  0xa5   :  { %2234 = vmatprep.subr.bf16.mxu1 %v2717_v4 }
  0xa7   :  { %2219 = vmatpush3.bf16.msra.mxu0 %v2796_v5  ;;  %2213 = vmatmul.mubr.msk.bf16.vlgmr.msra.gmra.mrb[4].mxu1 %vm98_vm3, %v249_v31 }
  0xa8   :  { %2235 = vmatpush3.bf16.msra.mxu1 %v2788_v3  ;;  %2220 = vmatprep.subr.bf16.mxu0 %v2717_v4 }
  0xa9   :  { %2236 = vmatprep.subr.bf16.mxu1 %v2717_v4  ;;  %2248 = vmatprep.mubr.msk.bf16.mxu1 %vm2720_vm0, %v2717_v4 }
  0xab   :  { %2221 = vmatpush3.bf16.msra.mxu0 %v2805_v8 }
  0xac   :  { %2237 = vmatpush3.bf16.msra.mxu1 %v2796_v5  ;;  %2222 = vmatprep.subr.bf16.mxu0 %v2717_v4 }
  0xad   :  { %2238 = vmatprep.subr.bf16.mxu1 %v2717_v4 }
  0xaf   :  { %2223 = vmatpush3.bf16.msra.mxu0 %v2817_v11 }
  0xb0   :  { %2239 = vmatpush3.bf16.msra.mxu1 %v2805_v8  ;;  %2224 = vmatprep.subr.bf16.mxu0 %v2717_v4 }
  0xb1   :  { %2240 = vmatprep.subr.bf16.mxu1 %v2717_v4 }
  0xb3   :  { %2225 = vmatpush3.bf16.msra.mxu0 %v2826_v12 }
  0xb4   :  { %2241 = vmatpush3.bf16.msra.mxu1 %v2817_v11  ;;  %2226 = vmatprep.subr.bf16.mxu0 %v2717_v4 }
  0xb5   :  { %2242 = vmatprep.subr.bf16.mxu1 %v2717_v4 }
  0xb7   :  { %2227 = vmatpush3.bf16.msra.mxu0 %v2836_v15 }
  0xb8   :  { %2243 = vmatpush3.bf16.msra.mxu1 %v2826_v12  ;;  %2228 = vmatprep.subr.bf16.mxu0 %v2717_v4 }
  0xb9   :  { %2244 = vmatprep.subr.bf16.mxu1 %v2717_v4 }
  0xbb   :  { %2229 = vmatpush3.bf16.msra.mxu0 %v2846_v17 }
  0xbc   :  { %2245 = vmatpush3.bf16.msra.mxu1 %v2836_v15  ;;  %2252 = vmatprep.subr.bf16.mxu0 %v2717_v4 }
  0xbd   :  { %2246 = vmatprep.subr.bf16.mxu1 %v2717_v4 }
  0xbe   :  { %2231 = vmatmul.mubr.msk.bf16.vlgmr.msra.gmra.mrb[8].mxu0 %vm98_vm3, %v298_v35 }
  0xbf   :  { %2253 = vmatpush3.bf16.msra.mxu0 %v2788_v3  ;;  %2266 = vmatprep.mubr.msk.bf16.mxu0 %vm2720_vm0, %v2717_v4 }
  0xc0   :  { %2247 = vmatpush3.bf16.msra.mxu1 %v2846_v17  ;;  %2254 = vmatprep.subr.bf16.mxu0 %v2717_v4 }
  0xc1   :  { %2270 = vmatprep.subr.bf16.mxu1 %v2717_v4 }
  0xc3   :  { %2249 = vmatmul.mubr.msk.bf16.vlgmr.msra.gmra.mrb[8].mxu1 %vm98_vm3, %v347_v37  ;;  %2255 = vmatpush3.bf16.msra.mxu0 %v2796_v5 }
  0xc4   :  { %2271 = vmatpush3.bf16.msra.mxu1 %v2788_v3  ;;  %2256 = vmatprep.subr.bf16.mxu0 %v2717_v4 }
  0xc5   :  { %2272 = vmatprep.subr.bf16.mxu1 %v2717_v4  ;;  %2284 = vmatprep.mubr.msk.bf16.mxu1 %vm2720_vm0, %v2717_v4 }
  0xc7   :  { %2257 = vmatpush3.bf16.msra.mxu0 %v2805_v8 }
  0xc8   :  { %2273 = vmatpush3.bf16.msra.mxu1 %v2796_v5  ;;  %2258 = vmatprep.subr.bf16.mxu0 %v2717_v4 }
  0xc9   :  { %2274 = vmatprep.subr.bf16.mxu1 %v2717_v4 }
  0xcb   :  { %2259 = vmatpush3.bf16.msra.mxu0 %v2817_v11 }
  0xcc   :  { %2275 = vmatpush3.bf16.msra.mxu1 %v2805_v8  ;;  %2260 = vmatprep.subr.bf16.mxu0 %v2717_v4 }
  0xcd   :  { %2276 = vmatprep.subr.bf16.mxu1 %v2717_v4 }
  0xcf   :  { %2261 = vmatpush3.bf16.msra.mxu0 %v2826_v12 }
  0xd0   :  { %2277 = vmatpush3.bf16.msra.mxu1 %v2817_v11  ;;  %2262 = vmatprep.subr.bf16.mxu0 %v2717_v4 }
  0xd1   :  { %2278 = vmatprep.subr.bf16.mxu1 %v2717_v4 }
  0xd3   :  { %2263 = vmatpush3.bf16.msra.mxu0 %v2836_v15 }
  0xd4   :  { %2279 = vmatpush3.bf16.msra.mxu1 %v2826_v12  ;;  %2264 = vmatprep.subr.bf16.mxu0 %v2717_v4 }
  0xd5   :  { %2280 = vmatprep.subr.bf16.mxu1 %v2717_v4 }
  0xd7   :  { %2265 = vmatpush3.bf16.msra.mxu0 %v2846_v17 }
  0xd8   :  { %2281 = vmatpush3.bf16.msra.mxu1 %v2836_v15  ;;  %2288 = vmatprep.subr.bf16.mxu0 %v2717_v4 }
  0xd9   :  { %2282 = vmatprep.subr.bf16.mxu1 %v2717_v4 }
  0xda   :  { %2267 = vmatmul.mubr.msk.bf16.vlgmr.msra.gmra.mrb[12].mxu0 %vm98_vm3, %v396_v41 }
  0xdb   :  { %2289 = vmatpush3.bf16.msra.mxu0 %v2971_v42  ;;  %2296 = vmatprep.mubr.msk.bf16.mxu0 %vm2720_vm0, %v2717_v4 }
  0xdc   :  { %2283 = vmatpush3.bf16.msra.mxu1 %v2846_v17  ;;  %2290 = vmatprep.subr.bf16.mxu0 %v2717_v4 }
  0xdd   :  { %2300 = vmatprep.subr.bf16.mxu1 %v2717_v4 }
  0xdf   :  { %2285 = vmatmul.mubr.msk.bf16.vlgmr.msra.gmra.mrb[12].mxu1 %vm98_vm3, %v445_v44  ;;  %2291 = vmatpush3.bf16.msra.mxu0 %v2982_v45 }
  0xe0   :  { %2292 = vmatprep.subr.bf16.mxu0 %v2717_v4  ;;  %2301 = vmatpush3.bf16.msra.mxu1 %v2971_v42 }
  0xe1   :  { %2302 = vmatprep.subr.bf16.mxu1 %v2717_v4  ;;  %2308 = vmatprep.mubr.msk.bf16.mxu1 %vm2720_vm0, %v2717_v4 }
  0xe3   :  { %2293 = vmatpush3.bf16.msra.mxu0 %v2994_v46 }
  0xe4   :  { %2294 = vmatprep.subr.bf16.mxu0 %v2717_v4  ;;  %2303 = vmatpush3.bf16.msra.mxu1 %v2982_v45 }
  0xe5   :  { %2304 = vmatprep.subr.bf16.mxu1 %v2717_v4 }
  0xe7   :  { %2295 = vmatpush3.bf16.msra.mxu0 %v3005_v47 }
  0xe8   :  { %2305 = vmatpush3.bf16.msra.mxu1 %v2994_v46  ;;  %2312 = vmatprep.subr.bf16.mxu0 %v2717_v4 }
  0xe9   :  { %2306 = vmatprep.subr.bf16.mxu1 %v2717_v4 }
  0xea   :  { %2297 = vmatmul.mubr.bf16.vlgmr.msra.gmra.mrb[16].mxu0 %v2715_v1 }
  0xeb   :  { %2313 = vmatpush3.bf16.msra.mxu0 %v2971_v42  ;;  %2320 = vmatprep.mubr.msk.bf16.mxu0 %vm2720_vm0, %v2717_v4 }
  0xec   :  { %2307 = vmatpush3.bf16.msra.mxu1 %v3005_v47  ;;  %2314 = vmatprep.subr.bf16.mxu0 %v2717_v4 }
  0xed   :  { %2324 = vmatprep.subr.bf16.mxu1 %v2717_v4 }
  0xef   :  { %2315 = vmatpush3.bf16.msra.mxu0 %v2982_v45 }
  0xf0   :  { %2316 = vmatprep.subr.bf16.mxu0 %v2717_v4 }
  0xf3   :  { %2317 = vmatpush3.bf16.msra.mxu0 %v2994_v46 }
  0xf4   :  { %2318 = vmatprep.subr.bf16.mxu0 %v2717_v4 }
  0xf7   :  { %2319 = vmatpush3.bf16.msra.mxu0 %v3005_v47 }
  0xf8   :  { %2336 = vmatprep.subr.bf16.mxu0 %v2717_v4 }
 0x159   :  { %v140_v48 = vpop.f32.mrb[0].mxu0 }
 0x15a   :  { %v2160_v49 = vpop.f32.mrb[1].mxu0 }
 0x15b   :  { %v143_v50 = vpop.f32.mrb[2].mxu0 }
 0x15c   :  { %v2161_v51 = vpop.f32.mrb[3].mxu0 }
 0x15e   :  { %v189_v52 = vpop.f32.mrb[0].mxu1 }
 0x15f   :  { %v2178_v53 = vpop.f32.mrb[1].mxu1 }
 0x160   :  { %v192_v54 = vpop.f32.mrb[2].mxu1 }
 0x161   :  { %v2179_v55 = vpop.f32.mrb[3].mxu1 }
 0x175   :  { %v238_v56 = vpop.f32.mrb[4].mxu0 }
 0x176   :  { %v2196_v57 = vpop.f32.mrb[5].mxu0 }
 0x177   :  { %v241_v58 = vpop.f32.mrb[6].mxu0 }
 0x178   :  { %v2197_v59 = vpop.f32.mrb[7].mxu0 }
 0x17a   :  { %v287_v60 = vpop.f32.mrb[4].mxu1 }
 0x17b   :  { %v2214_v61 = vpop.f32.mrb[5].mxu1 }
 0x17c   :  { %v290_v62 = vpop.f32.mrb[6].mxu1 }
 0x17d   :  { %v2215_v63 = vpop.f32.mrb[7].mxu1 }
 0x191   :  { %v336_v0 = vpop.f32.mrb[8].mxu0 }
 0x192   :  { %v2232_v2 = vpop.f32.mrb[9].mxu0  ;;  %v3030_v3 = vsel %vm489_vm11, %v287_v60, %v336_v0  ;;  %v3034_v5 = vsel %vm489_vm11, %v336_v0, %v287_v60 }
 0x193   :  { %v339_v6 = vpop.f32.mrb[10].mxu0 }
 0x194   :  { %v2233_v7 = vpop.f32.mrb[11].mxu0 }
 0x196   :  { %v385_v8 = vpop.f32.mrb[8].mxu1 }
 0x197   :  { %v2250_v9 = vpop.f32.mrb[9].mxu1  ;;  %v616_v10 = vsel %vm489_vm11, %v238_v56, %v385_v8  ;;  %v3040_v11 = vsel %vm489_vm11, %v385_v8, %v238_v56 }
 0x198   :  { %v388_v12 = vpop.f32.mrb[10].mxu1  ;;  %v3156_v9 = vld [vmem:[%s3424_s3 + $0x10] sm:$0xff]  }
 0x199   :  { %v2251_v13 = vpop.f32.mrb[11].mxu1 }
 0x1ad   :  { %v434_v14 = vpop.f32.mrb[12].mxu0 }
 0x1ae   :  { %v2268_v15 = vpop.f32.mrb[13].mxu0  ;;  %v569_v16 = vsel %vm489_vm11, %v189_v52, %v434_v14  ;;  %v3046_v17 = vsel %vm489_vm11, %v434_v14, %v189_v52 }
 0x1af   :  { %v437_v18 = vpop.f32.mrb[14].mxu0 }
 0x1b0   :  { %v2269_v20 = vpop.f32.mrb[15].mxu0 }
 0x1b2   :  { %v483_v21 = vpop.f32.mrb[12].mxu1 }
 0x1b3   :  { %v2286_v22 = vpop.f32.mrb[13].mxu1  ;;  %v498_v23 = vsel %vm489_vm11, %v140_v48, %v483_v21  ;;  %v3052_v24 = vsel %vm489_vm11, %v483_v21, %v140_v48 }
 0x1b4   :  { %v486_v25 = vpop.f32.mrb[14].mxu1 }
 0x1b5   :  { %v2287_v26 = vpop.f32.mrb[15].mxu1 }
 0x1bd   :  { %v561_v27 = vpop.f32.mrb[16].mxu0 }
 0x1be   :  { %v567_v28 = vadd.f32 %v561_v27, %v498_v23  ;;  %v2298_v29 = vpop.f32.mrb[17].mxu0 }
 0x1bf   :  { %v564_v30 = vpop.f32.mrb[18].mxu0 }
 0x1c0   :  { %2657 = vtanh.f32 %v567_v28  ;;  %v2299_v31 = vpop.f32.mrb[19].mxu0 }
 0x1ca   :  { %v3054_v32 = vpop.eup %2657 }
 0x1cb   :  { %v570_v33 = vpack.c.bf16 %v3054_v32, %v3054_v32 }
 0x1cd   :  { %2309 = vmatmul.mubr.msk.bf16.vlgmr.msra.gmra.mrb[16].mxu1 %vm523_vm12, %v570_v33 }
 0x1ce   :  { %2325 = vmatpush3.bf16.msra.mxu1 %v2971_v42  ;;  %2332 = vmatprep.mubr.msk.bf16.mxu1 %vm2720_vm0, %v2717_v4 }
 0x1cf   :  { %2326 = vmatprep.subr.bf16.mxu1 %v2717_v4 }
 0x1d2   :  { %2327 = vmatpush3.bf16.msra.mxu1 %v2982_v45 }
 0x1d3   :  { %2328 = vmatprep.subr.bf16.mxu1 %v2717_v4 }
 0x1d6   :  { %2329 = vmatpush3.bf16.msra.mxu1 %v2994_v46 }
 0x1d7   :  { %2330 = vmatprep.subr.bf16.mxu1 %v2717_v4 }
 0x1da   :  { %2331 = vmatpush3.bf16.msra.mxu1 %v3005_v47 }
 0x1db   :  { %2348 = vmatprep.subr.bf16.mxu1 %v2717_v4 }
 0x2a0   :  { %v608_v34 = vpop.f32.mrb[16].mxu1 }
 0x2a1   :  { %v614_v35 = vadd.f32 %v608_v34, %v569_v16  ;;  %v2310_v36 = vpop.f32.mrb[17].mxu1 }
 0x2a2   :  { %v611_v37 = vpop.f32.mrb[18].mxu1 }
 0x2a3   :  { %2659 = vtanh.f32 %v614_v35  ;;  %v2311_v38 = vpop.f32.mrb[19].mxu1 }
 0x2ad   :  { %v3069_v39 = vpop.eup %2659 }
 0x2ae   :  { %v617_v40 = vpack.c.bf16 %v3069_v39, %v3069_v39 }
 0x2b0   :  { %2321 = vmatmul.mubr.msk.bf16.vlgmr.msra.gmra.mrb[20].mxu0 %vm523_vm12, %v617_v40 }
 0x2b1   :  { %2337 = vmatpush3.bf16.msra.mxu0 %v2971_v42  ;;  %2344 = vmatprep.mubr.msk.bf16.mxu0 %vm2720_vm0, %v2717_v4 }
 0x2b2   :  { %2338 = vmatprep.subr.bf16.mxu0 %v2717_v4 }
 0x2b5   :  { %2339 = vmatpush3.bf16.msra.mxu0 %v2982_v45 }
 0x2b6   :  { %2340 = vmatprep.subr.bf16.mxu0 %v2717_v4 }
 0x2b9   :  { %2341 = vmatpush3.bf16.msra.mxu0 %v2994_v46 }
 0x2ba   :  { %2342 = vmatprep.subr.bf16.mxu0 %v2717_v4 }
 0x2bd   :  { %2343 = vmatpush3.bf16.msra.mxu0 %v3005_v47 }
 0x2be   :  { %2360 = vmatprep.subr.bf16.mxu0 %v2717_v4 }
 0x383   :  { %v655_v41 = vpop.f32.mrb[20].mxu0 }
 0x384   :  { %v661_v43 = vadd.f32 %v655_v41, %v616_v10  ;;  %v2322_v44 = vpop.f32.mrb[21].mxu0  ;;  %v3163_v10 = vld [vmem:[%s3424_s3 + $0x18] sm:$0xff]  }
 0x385   :  { %v658_v48 = vpop.f32.mrb[22].mxu0  ;;  %v2647_v44 = vld [vmem:[%s3425_s4] sm:$0xff]  }
 0x386   :  { %2661 = vtanh.f32 %v661_v43  ;;  %v2323_v49 = vpop.f32.mrb[23].mxu0 }
 0x387   :  { %v2648_v49 = vld [vmem:[%s3425_s4 + $0x8] sm:$0xff]  }
 0x390   :  { %v3084_v50 = vpop.eup %2661 }
 0x391   :  { %v664_v51 = vpack.c.bf16 %v3084_v50, %v3084_v50 }
 0x393   :  { %2333 = vmatmul.mubr.msk.bf16.vlgmr.msra.gmra.mrb[20].mxu1 %vm523_vm12, %v664_v51 }
 0x394   :  { %2349 = vmatpush3.bf16.msra.mxu1 %v2971_v42  ;;  %2356 = vmatprep.mubr.msk.bf16.mxu1 %vm2720_vm0, %v2717_v4 }
 0x395   :  { %2350 = vmatprep.subr.bf16.mxu1 %v2717_v4 }
 0x398   :  { %2351 = vmatpush3.bf16.msra.mxu1 %v2982_v45 }
 0x399   :  { %2352 = vmatprep.subr.bf16.mxu1 %v2717_v4 }
 0x39c   :  { %2353 = vmatpush3.bf16.msra.mxu1 %v2994_v46 }
 0x39d   :  { %2354 = vmatprep.subr.bf16.mxu1 %v2717_v4 }
 0x3a0   :  { %2355 = vmatpush3.bf16.msra.mxu1 %v3005_v47 }
 0x3a1   :  { %2372 = vmatprep.subr.bf16.mxu1 %v2717_v4 }
 0x466   :  { %v702_v52 = vpop.f32.mrb[20].mxu1 }
 0x467   :  { %v708_v53 = vadd.f32 %v702_v52, %v3030_v3  ;;  %v2334_v54 = vpop.f32.mrb[21].mxu1 }
 0x468   :  { %v705_v55 = vpop.f32.mrb[22].mxu1 }
 0x469   :  { %2663 = vtanh.f32 %v708_v53  ;;  %v2335_v56 = vpop.f32.mrb[23].mxu1 }
 0x473   :  { %v3100_v57 = vpop.eup %2663 }
 0x474   :  { %v711_v58 = vpack.c.bf16 %v3100_v57, %v3100_v57 }
 0x476   :  { %2345 = vmatmul.mubr.msk.bf16.vlgmr.msra.gmra.mrb[24].mxu0 %vm523_vm12, %v711_v58 }
 0x477   :  { %2361 = vmatpush3.bf16.msra.mxu0 %v2971_v42  ;;  %2368 = vmatprep.mubr.msk.bf16.mxu0 %vm2720_vm0, %v2717_v4 }
 0x478   :  { %2362 = vmatprep.subr.bf16.mxu0 %v2717_v4 }
 0x47b   :  { %2363 = vmatpush3.bf16.msra.mxu0 %v2982_v45 }
 0x47c   :  { %2364 = vmatprep.subr.bf16.mxu0 %v2717_v4 }
 0x47f   :  { %2365 = vmatpush3.bf16.msra.mxu0 %v2994_v46 }
 0x480   :  { %2366 = vmatprep.subr.bf16.mxu0 %v2717_v4 }
 0x483   :  { %2367 = vmatpush3.bf16.msra.mxu0 %v3005_v47 }
 0x484   :  { %2384 = vmatprep.subr.bf16.mxu0 %v2717_v4 }
 0x549   :  { %v749_v59 = vpop.f32.mrb[24].mxu0 }
 0x54a   :  { %v755_v60 = vadd.f32 %v749_v59, %v3034_v5  ;;  %v2346_v61 = vpop.f32.mrb[25].mxu0 }
 0x54b   :  { %v752_v62 = vpop.f32.mrb[26].mxu0 }
 0x54c   :  { %2665 = vtanh.f32 %v755_v60  ;;  %v2347_v63 = vpop.f32.mrb[27].mxu0 }
 0x556   :  { %v3116_v0 = vpop.eup %2665 }
 0x557   :  { %v758_v2 = vpack.c.bf16 %v3116_v0, %v3116_v0  ;;  %v1072_v21 = vsel %vm489_vm11, %v3100_v57, %v3116_v0  ;;  %v1117_v40 = vsel %vm489_vm11, %v3116_v0, %v3100_v57 }
 0x558   :  { %v1073_v22 = vpack.c.bf16 %v1072_v21, %v1072_v21  ;;  %v1118_v41 = vpack.c.bf16 %v1117_v40, %v1117_v40  ;;  %v2653_v40 = vld [vmem:[%s3429_s8 + $0x10] sm:$0xff]  }
 0x559   :  { %2357 = vmatmul.mubr.msk.bf16.vlgmr.msra.gmra.mrb[24].mxu1 %vm523_vm12, %v758_v2 }
 0x55a   :  { %2373 = vmatpush3.bf16.msra.mxu1 %v2971_v42  ;;  %2380 = vmatprep.mubr.msk.bf16.mxu1 %vm2720_vm0, %v2717_v4 }
 0x55b   :  { %2374 = vmatprep.subr.bf16.mxu1 %v2717_v4 }
 0x55e   :  { %2375 = vmatpush3.bf16.msra.mxu1 %v2982_v45 }
 0x55f   :  { %2376 = vmatprep.subr.bf16.mxu1 %v2717_v4 }
 0x562   :  { %2377 = vmatpush3.bf16.msra.mxu1 %v2994_v46  ;;  %v3142_v46 = vld [vmem:[%s3424_s3] sm:$0xff]  }
 0x563   :  { %2378 = vmatprep.subr.bf16.mxu1 %v2717_v4 }
 0x566   :  { %2379 = vmatpush3.bf16.msra.mxu1 %v3005_v47  ;;  %v3149_v47 = vld [vmem:[%s3424_s3 + $0x8] sm:$0xff]  }
 0x567   :  { %2396 = vmatprep.subr.bf16.mxu1 %v2717_v4 }
 0x62c   :  { %v796_v3 = vpop.f32.mrb[24].mxu1 }
 0x62d   :  { %v802_v42 = vadd.f32 %v796_v3, %v3040_v11  ;;  %v2358_v5 = vpop.f32.mrb[25].mxu1 }
 0x62e   :  { %v799_v6 = vpop.f32.mrb[26].mxu1 }
 0x62f   :  { %2667 = vtanh.f32 %v802_v42  ;;  %v2359_v7 = vpop.f32.mrb[27].mxu1 }
 0x639   :  { %v3132_v8 = vpop.eup %2667 }
 0x63a   :  { %v805_v45 = vpack.c.bf16 %v3132_v8, %v3132_v8  ;;  %v1162_v23 = vsel %vm489_vm11, %v3132_v8, %v3084_v50  ;;  %v1027_v37 = vsel %vm489_vm11, %v3084_v50, %v3132_v8 }
 0x63b   :  { %v1163_v25 = vpack.c.bf16 %v1162_v23, %v1162_v23  ;;  %v1028_v38 = vpack.c.bf16 %v1027_v37, %v1027_v37 }
 0x63c   :  { %2369 = vmatmul.mubr.msk.bf16.vlgmr.msra.gmra.mrb[28].mxu0 %vm523_vm12, %v805_v45 }
 0x63d   :  { %2392 = vmatprep.mubr.msk.bf16.mxu0 %vm2720_vm0, %v2717_v4  ;;  %2385 = vmatpush3.bf16.msra.mxu0 %v3142_v46 }
 0x63e   :  { %2386 = vmatprep.subr.bf16.mxu0 %v2717_v4 }
 0x641   :  { %2387 = vmatpush3.bf16.msra.mxu0 %v3149_v47 }
 0x642   :  { %2388 = vmatprep.subr.bf16.mxu0 %v2717_v4 }
 0x645   :  { %2389 = vmatpush3.bf16.msra.mxu0 %v3156_v9 }
 0x646   :  { %2390 = vmatprep.subr.bf16.mxu0 %v2717_v4 }
 0x649   :  { %2391 = vmatpush3.bf16.msra.mxu0 %v3163_v10 }
 0x64a   :  { %2408 = vmatprep.subr.bf16.mxu0 %v2717_v4 }
 0x70f   :  { %v843_v11 = vpop.f32.mrb[28].mxu0 }
 0x710   :  { %v849_v12 = vadd.f32 %v843_v11, %v3046_v17  ;;  %v2370_v13 = vpop.f32.mrb[29].mxu0 }
 0x711   :  { %v846_v14 = vpop.f32.mrb[30].mxu0 }
 0x712   :  { %2669 = vtanh.f32 %v849_v12  ;;  %v2371_v15 = vpop.f32.mrb[31].mxu0 }
 0x71c   :  { %v3168_v16 = vpop.eup %2669 }
 0x71d   :  { %v852_v18 = vpack.c.bf16 %v3168_v16, %v3168_v16  ;;  %v982_v17 = vsel %vm489_vm11, %v3069_v39, %v3168_v16  ;;  %v1207_v43 = vsel %vm489_vm11, %v3168_v16, %v3069_v39  ;;  %v2650_v39 = vld [vmem:[%s3425_s4 + $0x18] sm:$0xff]  }
 0x71e   :  { %v983_v20 = vpack.c.bf16 %v982_v17, %v982_v17  ;;  %v1208_v48 = vpack.c.bf16 %v1207_v43, %v1207_v43  ;;  %v2654_v43 = vld [vmem:[%s3429_s8 + $0x18] sm:$0xff]  }
 0x71f   :  { %2381 = vmatmul.mubr.msk.bf16.vlgmr.msra.gmra.mrb[28].mxu1 %vm523_vm12, %v852_v18 }
 0x720   :  { %2397 = vmatpush3.bf16.msra.mxu1 %v3142_v46  ;;  %2404 = vmatprep.mubr.msk.bf16.mxu1 %vm2720_vm0, %v2717_v4 }
 0x721   :  { %2398 = vmatprep.subr.bf16.mxu1 %v2717_v4 }
 0x724   :  { %2399 = vmatpush3.bf16.msra.mxu1 %v3149_v47 }
 0x725   :  { %2400 = vmatprep.subr.bf16.mxu1 %v2717_v4 }
 0x728   :  { %2401 = vmatpush3.bf16.msra.mxu1 %v3156_v9 }
 0x729   :  { %2402 = vmatprep.subr.bf16.mxu1 %v2717_v4 }
 0x72c   :  { %2403 = vmatpush3.bf16.msra.mxu1 %v3163_v10 }
 0x72d   :  { %2420 = vmatprep.subr.bf16.mxu1 %v2717_v4 }
 0x72f   :  { %2405 = vmatmul.mubr.msk.bf16.vlgmr.msra.gmra.mrb[32].mxu1 %vm523_vm12, %v983_v20 }
 0x730   :  { %2421 = vmatpush3.bf16.msra.mxu1 %v3142_v46  ;;  %2428 = vmatprep.mubr.msk.bf16.mxu1 %vm2720_vm0, %v2717_v4 }
 0x731   :  { %2422 = vmatprep.subr.bf16.mxu1 %v2717_v4 }
 0x734   :  { %2423 = vmatpush3.bf16.msra.mxu1 %v3149_v47 }
 0x735   :  { %2424 = vmatprep.subr.bf16.mxu1 %v2717_v4 }
 0x738   :  { %2425 = vmatpush3.bf16.msra.mxu1 %v3156_v9 }
 0x739   :  { %2426 = vmatprep.subr.bf16.mxu1 %v2717_v4 }
 0x73c   :  { %2427 = vmatpush3.bf16.msra.mxu1 %v3163_v10 }
 0x73d   :  { %2444 = vmatprep.subr.bf16.mxu1 %v2717_v4 }
 0x73f   :  { %2429 = vmatmul.mubr.msk.bf16.vlgmr.msra.gmra.mrb[36].mxu1 %vm523_vm12, %v1073_v22 }
 0x740   :  { %2445 = vmatpush3.bf16.msra.mxu1 %v3142_v46  ;;  %2452 = vmatprep.mubr.msk.bf16.mxu1 %vm2720_vm0, %v2717_v4 }
 0x741   :  { %2446 = vmatprep.subr.bf16.mxu1 %v2717_v4 }
 0x744   :  { %2447 = vmatpush3.bf16.msra.mxu1 %v3149_v47 }
 0x745   :  { %2448 = vmatprep.subr.bf16.mxu1 %v2717_v4 }
 0x748   :  { %2449 = vmatpush3.bf16.msra.mxu1 %v3156_v9 }
 0x749   :  { %2450 = vmatprep.subr.bf16.mxu1 %v2717_v4 }
 0x74c   :  { %2451 = vmatpush3.bf16.msra.mxu1 %v3163_v10 }
 0x74d   :  { %2468 = vmatprep.subr.bf16.mxu1 %v2717_v4 }
 0x74f   :  { %2453 = vmatmul.mubr.msk.bf16.vlgmr.msra.gmra.mrb[40].mxu1 %vm523_vm12, %v1163_v25 }
 0x750   :  { %2469 = vmatpush3.bf16.msra.mxu1 %v3142_v46  ;;  %2476 = vmatprep.mubr.msk.bf16.mxu1 %vm2720_vm0, %v2717_v4 }
 0x751   :  { %2470 = vmatprep.subr.bf16.mxu1 %v2717_v4 }
 0x754   :  { %2471 = vmatpush3.bf16.msra.mxu1 %v3149_v47 }
 0x755   :  { %2472 = vmatprep.subr.bf16.mxu1 %v2717_v4 }
 0x758   :  { %2473 = vmatpush3.bf16.msra.mxu1 %v3156_v9 }
 0x759   :  { %2474 = vmatprep.subr.bf16.mxu1 %v2717_v4 }
 0x75c   :  { %2475 = vmatpush3.bf16.msra.mxu1 %v3163_v10 }
 0x75d   :  { %2500 = vmatprep.subr.bf16.mxu1 %v2717_v4 }
 0x7f2   :  { %v890_v26 = vpop.f32.mrb[28].mxu1 }
 0x7f3   :  { %v896_v27 = vadd.f32 %v890_v26, %v3052_v24  ;;  %v2382_v28 = vpop.f32.mrb[29].mxu1  ;;  %v3240_v24 = vld [vmem:[%s3428_s7] sm:$0xff]  }
 0x7f4   :  { %v893_v29 = vpop.f32.mrb[30].mxu1 }
 0x7f5   :  { %2671 = vtanh.f32 %v896_v27  ;;  %v2383_v30 = vpop.f32.mrb[31].mxu1 }
 0x7ff   :  { %v2672_v31 = vpop.eup %2671 }
 0x800   :  { %v907_v33 = vsel %vm489_vm11, %v3054_v32, %v2672_v31  ;;  %v1252_v34 = vsel %vm489_vm11, %v2672_v31, %v3054_v32  ;;  %v3253_v32 = vld [vmem:[%s3428_s7 + $0x8] sm:$0xff]  }
 0x801   :  { %v908_v35 = vpack.c.bf16 %v907_v33, %v907_v33  ;;  %v1253_v36 = vpack.c.bf16 %v1252_v34, %v1252_v34 }
 0x803   :  { %2393 = vmatmul.mubr.msk.bf16.vlgmr.msra.gmra.mrb[32].mxu0 %vm523_vm12, %v908_v35  ;;  %2477 = vmatmul.mubr.msk.bf16.vlgmr.msra.gmra.mrb[44].mxu1 %vm523_vm12, %v1253_v36 }
 0x804   :  { %2409 = vmatpush3.bf16.msra.mxu0 %v3142_v46  ;;  %2416 = vmatprep.mubr.msk.bf16.mxu0 %vm2720_vm0, %v2717_v4 }
 0x805   :  { %2410 = vmatprep.subr.bf16.mxu0 %v2717_v4  ;;  %2501 = vmatpush3.bf16.msra.mxu1 %v3240_v24 }
 0x806   :  { %2502 = vmatprep.subr.bf16.mxu1 %v2717_v4  ;;  %2504 = vmatprep.mubr.msk.bf16.mxu1 %vm2720_vm0, %v2717_v4 }
 0x808   :  { %2411 = vmatpush3.bf16.msra.mxu0 %v3149_v47 }
 0x809   :  { %2412 = vmatprep.subr.bf16.mxu0 %v2717_v4  ;;  %2503 = vmatpush3.bf16.msra.mxu1 %v3253_v32 }
 0x80a   :  { %2516 = vmatprep.subr.bf16.mxu1 %v2717_v4 }
 0x80c   :  { %2413 = vmatpush3.bf16.msra.mxu0 %v3156_v9 }
 0x80d   :  { %2414 = vmatprep.subr.bf16.mxu0 %v2717_v4 }
 0x810   :  { %2415 = vmatpush3.bf16.msra.mxu0 %v3163_v10 }
 0x811   :  { %2432 = vmatprep.subr.bf16.mxu0 %v2717_v4 }
 0x813   :  { %2417 = vmatmul.mubr.msk.bf16.vlgmr.msra.gmra.mrb[36].mxu0 %vm523_vm12, %v1028_v38 }
 0x814   :  { %2433 = vmatpush3.bf16.msra.mxu0 %v3142_v46  ;;  %2440 = vmatprep.mubr.msk.bf16.mxu0 %vm2720_vm0, %v2717_v4 }
 0x815   :  { %2434 = vmatprep.subr.bf16.mxu0 %v2717_v4 }
 0x818   :  { %2435 = vmatpush3.bf16.msra.mxu0 %v3149_v47 }
 0x819   :  { %2436 = vmatprep.subr.bf16.mxu0 %v2717_v4 }
 0x81c   :  { %2437 = vmatpush3.bf16.msra.mxu0 %v3156_v9 }
 0x81d   :  { %2438 = vmatprep.subr.bf16.mxu0 %v2717_v4 }
 0x820   :  { %2439 = vmatpush3.bf16.msra.mxu0 %v3163_v10 }
 0x821   :  { %2456 = vmatprep.subr.bf16.mxu0 %v2717_v4 }
 0x823   :  { %2441 = vmatmul.mubr.msk.bf16.vlgmr.msra.gmra.mrb[40].mxu0 %vm523_vm12, %v1118_v41 }
 0x824   :  { %2457 = vmatpush3.bf16.msra.mxu0 %v3142_v46  ;;  %2464 = vmatprep.mubr.msk.bf16.mxu0 %vm2720_vm0, %v2717_v4 }
 0x825   :  { %2458 = vmatprep.subr.bf16.mxu0 %v2717_v4 }
 0x828   :  { %2459 = vmatpush3.bf16.msra.mxu0 %v3149_v47 }
 0x829   :  { %2460 = vmatprep.subr.bf16.mxu0 %v2717_v4 }
 0x82c   :  { %2461 = vmatpush3.bf16.msra.mxu0 %v3156_v9 }
 0x82d   :  { %2462 = vmatprep.subr.bf16.mxu0 %v2717_v4 }
 0x830   :  { %2463 = vmatpush3.bf16.msra.mxu0 %v3163_v10 }
 0x831   :  { %2480 = vmatprep.subr.bf16.mxu0 %v2717_v4 }
 0x833   :  { %2465 = vmatmul.mubr.msk.bf16.vlgmr.msra.gmra.mrb[44].mxu0 %vm523_vm12, %v1208_v48 }
 0x834   :  { %2481 = vmatpush3.bf16.msra.mxu0 %v2647_v44  ;;  %2488 = vmatprep.mubr.msk.bf16.mxu0 %vm2720_vm0, %v2717_v4 }
 0x835   :  { %2482 = vmatprep.subr.bf16.mxu0 %v2717_v4 }
 0x838   :  { %2483 = vmatpush3.bf16.msra.mxu0 %v2648_v49  ;;  %v2655_v49 = vld [vmem:[%s3429_s8] sm:$0xff]  }
 0x839   :  { %2484 = vmatprep.subr.bf16.mxu0 %v2717_v4 }
 0x83c   :  { %2485 = vmatpush3.bf16.msra.mxu0 %v2649_v19  ;;  %v2656_v19 = vld [vmem:[%s3429_s8 + $0x8] sm:$0xff]   ;;  %s2725_s8 = smov [#allocation2]  }
 0x83d   :  { %2486 = vmatprep.subr.bf16.mxu0 %v2717_v4  ;;  %s1896_s19 = sshll.u32 %s2725_s8, 4  ;;  %s1897_s19 = int_to_ptr.vmem [resolvable:$true] %s1896_s19 }
 0x83e   :  { %s2691_s20 = scalar_lea.vmem %s1897_s19, 32  ;;  %p2696_p1 = scmp.lt.s32.totalorder %s1897_s19, %s1897_s19 }
 0x83f   :  { %p2692_p0 = scmp.ne.s32.totalorder %s1897_s19, %s2691_s20  ;;  %p2697_p2 = scmp.lt.s32.totalorder %s2691_s20, %s2691_s20 }
 0x840   :  { %2487 = vmatpush3.bf16.msra.mxu0 %v2650_v39 }
 0x841   :  { %2492 = vmatprep.subr.bf16.mxu0 %v2717_v4  ;;  %p2698_p3 = por %p2697_p2, %p2696_p1 }
 0x843   :  { %2489 = vmatmul.mubr.msk.bf16.vlgmr.msra.gmra.mrb[48].mxu0 %vm523_vm12, %v1253_v36  ;;  %v1943_v36 = vld [vmem:[%s3427_s6] ss:$0 sm:$0xff]  ;;  %p2699_p4 = pnand %p2698_p3, %p2692_p0 }
 0x844   :  { %2493 = vmatpush3.bf16.msra.mxu0 %v3240_v24  ;;  %2496 = vmatprep.mubr.msk.bf16.mxu0 %vm2720_vm0, %v2717_v4 }
 0x845   :  { %2494 = vmatprep.subr.bf16.mxu0 %v2717_v4 }
 0x848   :  { %2495 = vmatpush3.bf16.msra.mxu0 %v3253_v32 }
 0x849   :  { %2508 = vmatprep.subr.bf16.mxu0 %v2717_v4 }
 0x84b   :  { %2497 = vmatmul.mubr.bf16.vlgmr.msra.gmra.mrb[32].mxu0 %v2715_v1  ;;  %v3335_v1 = vld [vmem:[%s3426_s5] ss:$0 sm:$0xff] }
 0x84c   :  { %2509 = vmatpush3.bf16.msra.mxu0 %v3240_v24  ;;  %2512 = vmatprep.mubr.msk.bf16.mxu0 %vm2720_vm0, %v2717_v4 }
 0x84d   :  { %2510 = vmatprep.subr.bf16.mxu0 %v2717_v4 }
 0x850   :  { %2511 = vmatpush3.bf16.msra.mxu0 %v3253_v32 }
 0x851   :  { %2524 = vmatprep.subr.bf16.mxu0 %v2717_v4 }
 0x916   :  { %v3330_v50 = vpop.f32.mrb[48].mxu0 }
 0x917   :  { %v2490_v51 = vpop.f32.mrb[49].mxu0  ;;  %v1371_v37 = vadd.f32 %v1943_v36, %v3330_v50 }
 0x918   :  { %v1373_v52 = vpop.f32.mrb[50].mxu0 }
 0x919   :  { %v2491_v53 = vpop.f32.mrb[51].mxu0 }
 0x91e   :  { %v1430_v54 = vpop.f32.mrb[32].mxu0 }
 0x91f   :  { %v2572_v55 = vadd.f32 %v3335_v1, %v1430_v54  ;;  %v2498_v56 = vpop.f32.mrb[33].mxu0 }
 0x920   :  { %v1433_v57 = vpop.f32.mrb[34].mxu0 }
 0x921   :  { %2673 = vtanh.f32 %v2572_v55  ;;  %v2499_v58 = vpop.f32.mrb[35].mxu0 }
 0x92b   :  { %v2674_v59 = vpop.eup %2673 }
 0x92c   :  { %v1438_v60 = vpack.c.bf16 %v2674_v59, %v2674_v59 }
 0x92e   :  { %2505 = vmatmul.mubr.msk.bf16.vlgmr.msra.gmra.mrb[32].mxu1 %vm1393_vm13, %v1438_v60  ;;  %v1964_v60 = vld [vmem:[%s3430_s9] ss:$0 sm:$0xff] }
 0x92f   :  { %2517 = vmatpush3.bf16.msra.mxu1 %v3240_v24  ;;  %2520 = vmatprep.mubr.msk.bf16.mxu1 %vm2720_vm0, %v2717_v4 }
 0x930   :  { %2518 = vmatprep.subr.bf16.mxu1 %v2717_v4 }
 0x933   :  { %2519 = vmatpush3.bf16.msra.mxu1 %v3253_v32 }
 0x934   :  { %2532 = vmatprep.subr.bf16.mxu1 %v2717_v4 }
 0xa01   :  { %v1476_v61 = vpop.f32.mrb[32].mxu1 }
 0xa02   :  { %v2573_v62 = vadd.f32 %v3335_v1, %v1476_v61  ;;  %v2506_v63 = vpop.f32.mrb[33].mxu1 }
 0xa03   :  { %v1479_v0 = vpop.f32.mrb[34].mxu1 }
 0xa04   :  { %2675 = vtanh.f32 %v2573_v62  ;;  %v2507_v2 = vpop.f32.mrb[35].mxu1 }
 0xa0e   :  { %v2676_v3 = vpop.eup %2675 }
 0xa0f   :  { %v1484_v42 = vpack.c.bf16 %v2676_v3, %v2676_v3 }
 0xa11   :  { %2513 = vmatmul.mubr.msk.bf16.vlgmr.msra.gmra.mrb[36].mxu0 %vm1393_vm13, %v1484_v42 }
 0xa12   :  { %2525 = vmatpush3.bf16.msra.mxu0 %v3240_v24  ;;  %2528 = vmatprep.mubr.msk.bf16.mxu0 %vm2720_vm0, %v2717_v4 }
 0xa13   :  { %2526 = vmatprep.subr.bf16.mxu0 %v2717_v4 }
 0xa16   :  { %2527 = vmatpush3.bf16.msra.mxu0 %v3253_v32 }
 0xa17   :  { %2540 = vmatprep.subr.bf16.mxu0 %v2717_v4 }
 0xae4   :  { %v1522_v5 = vpop.f32.mrb[36].mxu0 }
 0xae5   :  { %v2574_v6 = vadd.f32 %v3335_v1, %v1522_v5  ;;  %v2514_v7 = vpop.f32.mrb[37].mxu0 }
 0xae6   :  { %v1525_v8 = vpop.f32.mrb[38].mxu0 }
 0xae7   :  { %2677 = vtanh.f32 %v2574_v6  ;;  %v2515_v45 = vpop.f32.mrb[39].mxu0 }
 0xaf1   :  { %v2678_v46 = vpop.eup %2677 }
 0xaf2   :  { %v1530_v47 = vpack.c.bf16 %v2678_v46, %v2678_v46 }
 0xaf4   :  { %2521 = vmatmul.mubr.msk.bf16.vlgmr.msra.gmra.mrb[36].mxu1 %vm1393_vm13, %v1530_v47 }
 0xaf5   :  { %2533 = vmatpush3.bf16.msra.mxu1 %v3240_v24  ;;  %2536 = vmatprep.mubr.msk.bf16.mxu1 %vm2720_vm0, %v2717_v4 }
 0xaf6   :  { %2534 = vmatprep.subr.bf16.mxu1 %v2717_v4 }
 0xaf9   :  { %2535 = vmatpush3.bf16.msra.mxu1 %v3253_v32 }
 0xafa   :  { %2548 = vmatprep.subr.bf16.mxu1 %v2717_v4 }
 0xbc7   :  { %v1568_v9 = vpop.f32.mrb[36].mxu1 }
 0xbc8   :  { %v2575_v10 = vadd.f32 %v3335_v1, %v1568_v9  ;;  %v2522_v11 = vpop.f32.mrb[37].mxu1 }
 0xbc9   :  { %v1571_v12 = vpop.f32.mrb[38].mxu1 }
 0xbca   :  { %2679 = vtanh.f32 %v2575_v10  ;;  %v2523_v13 = vpop.f32.mrb[39].mxu1 }
 0xbd4   :  { %v2680_v14 = vpop.eup %2679 }
 0xbd5   :  { %v1576_v15 = vpack.c.bf16 %v2680_v14, %v2680_v14 }
 0xbd7   :  { %2529 = vmatmul.mubr.msk.bf16.vlgmr.msra.gmra.mrb[40].mxu0 %vm1393_vm13, %v1576_v15 }
 0xbd8   :  { %2541 = vmatpush3.bf16.msra.mxu0 %v3240_v24  ;;  %2544 = vmatprep.mubr.msk.bf16.mxu0 %vm2720_vm0, %v2717_v4 }
 0xbd9   :  { %2542 = vmatprep.subr.bf16.mxu0 %v2717_v4 }
 0xbdc   :  { %2543 = vmatpush3.bf16.msra.mxu0 %v3253_v32 }
 0xcaa   :  { %v1614_v16 = vpop.f32.mrb[40].mxu0 }
 0xcab   :  { %v2576_v18 = vadd.f32 %v3335_v1, %v1614_v16  ;;  %v2530_v17 = vpop.f32.mrb[41].mxu0 }
 0xcac   :  { %v1617_v20 = vpop.f32.mrb[42].mxu0 }
 0xcad   :  { %2681 = vtanh.f32 %v2576_v18  ;;  %v2531_v21 = vpop.f32.mrb[43].mxu0 }
 0xcb7   :  { %v2682_v22 = vpop.eup %2681 }
 0xcb8   :  { %v1622_v23 = vpack.c.bf16 %v2682_v22, %v2682_v22 }
 0xcba   :  { %2537 = vmatmul.mubr.msk.bf16.vlgmr.msra.gmra.mrb[40].mxu1 %vm1393_vm13, %v1622_v23 }
 0xcbb   :  { %2549 = vmatpush3.bf16.msra.mxu1 %v3240_v24  ;;  %2552 = vmatprep.mubr.msk.bf16.mxu1 %vm2720_vm0, %v2717_v4 }
 0xcbc   :  { %2550 = vmatprep.subr.bf16.mxu1 %v2717_v4 }
 0xcbf   :  { %2551 = vmatpush3.bf16.msra.mxu1 %v3253_v32 }
 0xcc0   :  { %2556 = vmatprep.subr.bf16.mxu1 %v2717_v4 }
 0xd8d   :  { %v1660_v25 = vpop.f32.mrb[40].mxu1 }
 0xd8e   :  { %v2577_v26 = vadd.f32 %v3335_v1, %v1660_v25  ;;  %v2538_v27 = vpop.f32.mrb[41].mxu1 }
 0xd8f   :  { %v1663_v28 = vpop.f32.mrb[42].mxu1 }
 0xd90   :  { %2683 = vtanh.f32 %v2577_v26  ;;  %v2539_v29 = vpop.f32.mrb[43].mxu1 }
 0xd9a   :  { %v2684_v30 = vpop.eup %2683 }
 0xd9b   :  { %v1668_v31 = vpack.c.bf16 %v2684_v30, %v2684_v30 }
 0xd9d   :  { %2545 = vmatmul.mubr.msk.bf16.vlgmr.msra.gmra.mrb[44].mxu0 %vm1393_vm13, %v1668_v31 }
 0xe70   :  { %v1706_v33 = vpop.f32.mrb[44].mxu0 }
 0xe71   :  { %v2578_v34 = vadd.f32 %v3335_v1, %v1706_v33  ;;  %v2546_v35 = vpop.f32.mrb[45].mxu0 }
 0xe72   :  { %v1709_v24 = vpop.f32.mrb[46].mxu0 }
 0xe73   :  { %2685 = vtanh.f32 %v2578_v34  ;;  %v2547_v32 = vpop.f32.mrb[47].mxu0 }
 0xe74   :  { %2687 = vtanh.f32 %v1371_v37 }
 0xe7d   :  { %v2686_v38 = vpop.eup %2685 }
 0xe7e   :  { %v1714_v41 = vpack.c.bf16 %v2686_v38, %v2686_v38  ;;  %v2688_v44 = vpop.eup %2687 }
 0xe7f   :  { %v1769_v48 = vpack.c.bf16 %v2688_v44, %v2688_v44 }
 0xe80   :  { %2553 = vmatmul.mubr.msk.bf16.vlgmr.msra.gmra.mrb[44].mxu1 %vm1393_vm13, %v1714_v41 }
 0xe81   :  { %2557 = vmatpush3.bf16.msra.mxu1 %v2653_v40  ;;  %2560 = vmatprep.mubr.msk.bf16.mxu1 %vm2720_vm0, %v2717_v4 }
 0xe82   :  { %2558 = vmatprep.subr.bf16.mxu1 %v2717_v4 }
 0xe85   :  { %2559 = vmatpush3.bf16.msra.mxu1 %v2654_v43 }
 0xe86   :  { %2564 = vmatprep.subr.bf16.mxu1 %v2717_v4 }
 0xe88   :  { %2561 = vmatmul.mubr.msk.bf16.vlgmr.msra.gmra.mrb[48].mxu1 %vm1393_vm13, %v1769_v48 }
 0xe89   :  { %2568 = vmatprep.mubr.msk.bf16.mxu1 %vm2720_vm0, %v2717_v4  ;;  %2565 = vmatpush3.bf16.msra.mxu1 %v2655_v49 }
 0xe8a   :  { %2566 = vmatprep.subr.bf16.mxu1 %v2717_v4 }
 0xe8d   :  { %2567 = vmatpush3.bf16.msra.mxu1 %v2656_v19 }
 0xf53   :  { %v1752_v39 = vpop.f32.mrb[44].mxu1 }
 0xf54   :  { %v2579_v50 = vadd.f32 %v3335_v1, %v1752_v39  ;;  %v2554_v51 = vpop.f32.mrb[45].mxu1 }
 0xf55   :  { %v1755_v52 = vpop.f32.mrb[46].mxu1 }
 0xf56   :  { %2689 = vtanh.f32 %v2579_v50  ;;  %v2555_v53 = vpop.f32.mrb[47].mxu1 }
 0xf5b   :  { %v1819_v54 = vpop.f32.mrb[48].mxu1 }
 0xf5c   :  { %v2562_v55 = vpop.f32.mrb[49].mxu1 }
 0xf5d   :  { %v1822_v56 = vpop.f32.mrb[50].mxu1 }
 0xf5e   :  { %v2563_v57 = vpop.f32.mrb[51].mxu1 }
 0xf60   :  { %v2690_v58 = vpop.eup %2689 }
 0xf61   :  { %v1768_v59 = vpack.c.bf16 %v2690_v58, %v2690_v58 }
 0xf63   :  { %2569 = vmatmul.mubr.msk.bf16.vlgmr.msra.gmra.mrb[52].mxu1 %vm1393_vm13, %v1768_v59 }
0x1036   :  { %v1874_v4 = vpop.f32.mrb[52].mxu1 }
0x1037   :  { %v1875_v1 = vadd.f32 %v1874_v4, %v1819_v54  ;;  %v2570_v61 = vpop.f32.mrb[53].mxu1 }
0x1038   :  { %v1877_v62 = vpop.f32.mrb[54].mxu1 }
0x1039   :  { %v1887_v63 = vadd.f32 %v1964_v60, %v1875_v1  ;;  %v2571_v0 = vpop.f32.mrb[55].mxu1 }
0x103b   :  { %1889 = vst.msk [vmem:[#allocation2] sm:$0x3] %vm1888_vm14, %v1887_v63 }
0x103c   :  { %2702 = shalt.err (!%p2699_p4)
}
0x103d   :  { %s2703_s9 = scalar_lea.hbm %s3431_s10, 32 }
0x103e   :  { %p2704_p5 = scmp.ne.s32.totalorder %s3431_s10, %s2703_s9  ;;  %p2707_p6 = scmp.lt.u32.totalorder %s2703_s9, %s3431_s10 }
0x1040   :  { %p2709_p7 = pnand %p2707_p6, %p2704_p5 }
0x1042   :  { %2712 = shalt.err (!%p2709_p7)
}
0x1043   :  { %1899 = dma.vmem_to_hbm [thread:$0]  %s1897_s19, 32, %s3431_s10, [#allocation3]  }
0x1044   :  { %2713 = dma.done.wait [#allocation3], 32  }
0x1045   :  { %2714 = vsyncadd [#allocation3], 4294967264 }
0x1046   :  { %1903 = vsyncpa [#allocation3], 1 }

</bundles_post_ra>
